<compile_context>
chip_gen: v7x
topology: tpu7x:2x2x1
jax: 0.10.0
libtpu: 0.0.40
codegen_flags: <defaults>
</compile_context>

<pallas_src>
import numpy as np
import jax
import jax.numpy as jnp
from jax.experimental import pallas as pl
from jax.experimental.pallas import tpu as pltpu

N_WIRES = 9
N_LAYERS = 9
DIM = 2 ** N_WIRES        # 512
GA = 4                    # group-A wires 0..3  -> 2^4 = 16 columns
GB = N_WIRES - GA         # group-B wires 4..8  -> 2^5 = 32 columns
DIMA = 2 ** GA            # 16
DIMB = 2 ** GB            # 32
H_PAD = 128               # padded hidden width (lane-dense MLP intermediates)
ANG_PAD = 16              # padded angle lanes
OUT_LANES = 128           # padded output lanes (lane-dense final store)
MAX_TILE_B = 1024         # batch tile cap
VMEM_LIMIT = 48 * 1024 * 1024   # explicit scoped-VMEM budget (fits all gens)


# ---------------- host-side parameter setup (plain numpy / JAX glue) ------------

def _rx_mat(theta):
    c, s = np.cos(theta / 2.0), np.sin(theta / 2.0)
    return np.array([[c, -1j * s], [-1j * s, c]], dtype=np.complex128)


def _apply_rx_left(U, theta, wire):
    # U <- (I ⊗ RX ⊗ I) @ U ; wire 0 is the most-significant bit (PennyLane order)
    g = _rx_mat(theta)
    Ur = U.reshape(2 ** wire, 2, 2 ** (N_WIRES - 1 - wire), DIM)
    return np.einsum("xy,aybc->axbc", g, Ur).reshape(DIM, DIM)


def _apply_cnot_left(U, ctrl, tgt):
    rows = np.arange(DIM)
    cbit = (rows >> (N_WIRES - 1 - ctrl)) & 1
    sigma = np.where(cbit == 1, rows ^ (1 << (N_WIRES - 1 - tgt)), rows)
    return U[sigma, :]


def build_entangler_unitary(weights):
    """Unitary of qml.BasicEntanglerLayers(weights): per layer RX on each wire,
    then CNOT ring CNOT(i, (i+1) % n)."""
    U = np.eye(DIM, dtype=np.complex128)
    for l in range(weights.shape[0]):
        for i in range(N_WIRES):
            U = _apply_rx_left(U, weights[l, i], i)
        for i in range(N_WIRES):
            U = _apply_cnot_left(U, i, (i + 1) % N_WIRES)
    return U


def init_linear(key, in_dim, out_dim):
    k1, k2 = jax.random.split(key)
    bound = 1.0 / np.sqrt(in_dim)
    w = jax.random.uniform(k1, (in_dim, out_dim), jnp.float32, -bound, bound)
    b = jax.random.uniform(k2, (1, out_dim), jnp.float32, -bound, bound)
    return w, b


# ---------------------------- Pallas kernel ------------------------------------

def qnet_kernel(x_ref, w1_ref, b1_ref, w2_ref, b2_ref, wq_ref, bq_ref,
                bita_ref, bitb_ref, ea_ref, eb_ref, ucat_ref, zw_ref, bo_ref,
                out_ref):
    f32 = jnp.float32
    bf16 = jnp.bfloat16

    # --- classical MLP trunk (padded to 128 lanes): ReLU, ReLU, -> angles ---
    x = x_ref[...]
    h = jnp.maximum(
        jnp.dot(x, w1_ref[...], preferred_element_type=f32) + b1_ref[...], 0.0)
    h = jnp.maximum(
        jnp.dot(h, w2_ref[...], preferred_element_type=f32) + b2_ref[...], 0.0)
    ang = jnp.dot(h, wq_ref[...], preferred_element_type=f32) + bq_ref[...]  # (TB,16)

    c = jnp.cos(ang * 0.5)
    d = jnp.sin(ang * 0.5) - c          # computed once, reused for every wire

    # --- AngleEmbedding product-state magnitudes via a 4+5 wire split ------
    # fa[b, j] = prod_{i<4}  (cos(a_i/2) if bit_i(j)==0 else sin(a_i/2)), j<16
    # fb[b, k] = prod_{i>=4} (cos(a_i/2) if bit_i(k)==0 else sin(a_i/2)), k<32
    bita = bita_ref[...]                # (4, 16) const
    bitb = bitb_ref[...]                # (5, 32) const
    fa = c[:, 0:1] + d[:, 0:1] * bita[0:1, :]
    for i in range(1, GA):
        fa = fa * (c[:, i:i + 1] + d[:, i:i + 1] * bita[i:i + 1, :])
    fb = c[:, GA:GA + 1] + d[:, GA:GA + 1] * bitb[0:1, :]
    for i in range(1, GB):
        w = GA + i
        fb = fb * (c[:, w:w + 1] + d[:, w:w + 1] * bitb[i:i + 1, :])

    # Expand each group to 512 columns with exact one-hot bf16 MXU matmuls,
    # combine with a single full-width multiply (phase folded into U on host).
    ma = jnp.dot(fa.astype(bf16), ea_ref[...], preferred_element_type=f32)   # (TB,512)
    mb = jnp.dot(fb.astype(bf16), eb_ref[...], preferred_element_type=f32)   # (TB,512)
    m = (ma * mb).astype(bf16)

    # --- entangler: one bf16 matmul against [Re(M) | Im(M)], M = diag(ph) @ U^T
    y = jnp.dot(m, ucat_ref[...], preferred_element_type=f32)                # (TB,1024)
    yy = y * y
    probs = yy[:, :DIM] + yy[:, DIM:]                                        # |psi|^2

    # --- <Z_k> and final Linear folded into zw = zsign @ W_out (bf16, 128 lanes)
    out_ref[...] = (jnp.dot(probs.astype(bf16), zw_ref[...],
                            preferred_element_type=f32) + bo_ref[...])       # lane-dense


def _round_up(n, m):
    return ((n + m - 1) // m) * m


def qnet_forward(obs, params, state=None):
    (w1, b1, w2, b2, wq, bq, bita, bitb, ea, eb, ucat, zw, bo_pad,
     action_dim) = params
    B = obs.shape[0]
    x = obs.reshape(B, -1).astype(jnp.float32)
    D = x.shape[1]

    # Batch tiling:
    #  * multiple of 8 sublanes,
    #  * >= 2 grid steps once B >= 16 so the "parallel" axis can shard across
    #    both TensorCores on v7x,
    #  * capped at MAX_TILE_B (explicit vmem_limit_bytes keeps all generations
    #    within budget, incl. v5e's 16 MiB scoped default).
    b8 = _round_up(B, 8)
    if b8 >= 16:
        tile_b = min(MAX_TILE_B, _round_up((b8 + 1) // 2, 8))
    else:
        tile_b = b8
    b_pad = _round_up(b8, tile_b)
    if b_pad != B:
        x = jnp.pad(x, ((0, b_pad - B), (0, 0)))
    grid = (b_pad // tile_b,)

    def const2(arr):  # full-array block, VMEM-resident across all grid steps
        return pl.BlockSpec(tuple(arr.shape), lambda i: (0, 0))

    in_specs = [
        pl.BlockSpec((tile_b, D), lambda i: (i, 0)),   # x: tiled over batch
        const2(w1), const2(b1), const2(w2), const2(b2), const2(wq), const2(bq),
        const2(bita), const2(bitb), const2(ea), const2(eb),
        const2(ucat), const2(zw), const2(bo_pad),
    ]
    out_specs = pl.BlockSpec((tile_b, OUT_LANES), lambda i: (i, 0))

    logits = pl.pallas_call(
        qnet_kernel,
        grid=grid,
        out_shape=jax.ShapeDtypeStruct((b_pad, OUT_LANES), jnp.float32),
        in_specs=in_specs,
        out_specs=out_specs,
        compiler_params=pltpu.CompilerParams(
            dimension_semantics=("parallel",),        # shards across TCs on v7x
            vmem_limit_bytes=VMEM_LIMIT),
    )(x, w1, b1, w2, b2, wq, bq, bita, bitb, ea, eb, ucat, zw, bo_pad)

    return logits[:B, :action_dim], state


# ---------------------------- numpy reference -----------------------------------

def _ref_quantum_layer(angles, weights):
    """fp64 statevector simulation (independent of the precomputed unitary path)."""
    B = angles.shape[0]
    outs = np.zeros((B, N_WIRES))
    rows = np.arange(DIM)
    for b in range(B):
        psi = np.zeros(DIM, dtype=np.complex128)
        psi[0] = 1.0
        psi = psi.reshape((2,) * N_WIRES)

        def apply_rx(psi, theta, w):
            g = _rx_mat(theta)
            psi = np.tensordot(g, psi, axes=([1], [w]))
            return np.moveaxis(psi, 0, w)

        for i in range(N_WIRES):
            psi = apply_rx(psi, angles[b, i], i)
        for l in range(weights.shape[0]):
            for i in range(N_WIRES):
                psi = apply_rx(psi, weights[l, i], i)
            for i in range(N_WIRES):
                ctrl, tgt = i, (i + 1) % N_WIRES
                flat = psi.reshape(DIM)
                cbit = (rows >> (N_WIRES - 1 - ctrl)) & 1
                sigma = np.where(cbit == 1, rows ^ (1 << (N_WIRES - 1 - tgt)), rows)
                psi = flat[sigma].reshape((2,) * N_WIRES)
        probs = np.abs(psi.reshape(DIM)) ** 2
        for k in range(N_WIRES):
            bitk = (rows >> (N_WIRES - 1 - k)) & 1
            outs[b, k] = np.sum(probs * (1.0 - 2.0 * bitk))
    return outs


if __name__ == "__main__":
    key = jax.random.PRNGKey(0)
    state_shape = (4, 16)        # input_dim = 64
    action_shape = 5             # output_dim = 5
    hidden_sizes = (32, 32)
    in_dim = int(np.prod(state_shape))

    keys = jax.random.split(key, 7)
    w1, b1 = init_linear(keys[0], in_dim, hidden_sizes[0])
    w2, b2 = init_linear(keys[1], hidden_sizes[0], hidden_sizes[1])
    wq, bq = init_linear(keys[2], hidden_sizes[1], N_WIRES)
    wo, bo = init_linear(keys[3], N_WIRES, action_shape)
    # qml.qnn.TorchLayer default init for BasicEntanglerLayers weights: U(0, 2*pi)
    qweights = np.asarray(
        jax.random.uniform(keys[4], (N_LAYERS, N_WIRES), jnp.float32, 0.0, 2.0 * np.pi),
        dtype=np.float64)

    # ---- host parameter setup: pad MLP widths to 128 lanes (exact zero padding) --
    def pad2(a, rows, cols, dtype=jnp.float32):
        out = np.zeros((rows, cols), np.float32)
        aa = np.asarray(a, np.float32)
        out[:aa.shape[0], :aa.shape[1]] = aa
        return jnp.asarray(out, dtype=dtype)

    w1p = pad2(w1, in_dim, H_PAD)
    b1p = pad2(b1, 1, H_PAD)
    w2p = pad2(w2, H_PAD, H_PAD)
    b2p = pad2(b2, 1, H_PAD)
    wqp = pad2(wq, H_PAD, ANG_PAD)
    bqp = pad2(bq, 1, ANG_PAD)

    # ---- bit tables for the 4+5 split and one-hot expansion matrices ------------
    colsA = np.arange(DIMA)
    colsB = np.arange(DIMB)
    cols = np.arange(DIM)
    bita = jnp.asarray(np.stack(
        [(colsA >> (GA - 1 - i)) & 1 for i in range(GA)]).astype(np.float32))   # (4,16)
    bitb = jnp.asarray(np.stack(
        [(colsB >> (GB - 1 - i)) & 1 for i in range(GB)]).astype(np.float32))   # (5,32)
    ea = jnp.asarray(np.equal.outer(colsA, cols >> 5).astype(np.float32),
                     jnp.bfloat16)                                               # (16,512)
    eb = jnp.asarray(np.equal.outer(colsB, cols & 31).astype(np.float32),
                     jnp.bfloat16)                                               # (32,512)

    # ---- fixed-weight entangler unitary, AngleEmbedding phases folded, [Re|Im] --
    U = build_entangler_unitary(qweights)
    rows = np.arange(DIM)
    bits = np.stack([((rows >> (N_WIRES - 1 - i)) & 1) for i in range(N_WIRES)],
                    axis=0)                                   # (9, 512)
    pop = bits.sum(axis=0)
    ph = (-1j) ** (pop % 4)                                   # (-i)^popcount phase
    M = ph[:, None] * U.T                                     # diag(ph) @ U^T
    ucat = jnp.asarray(
        np.concatenate([np.real(M), np.imag(M)], axis=1).astype(np.float32),
        jnp.bfloat16)                                         # (512, 1024)

    # ---- fold PauliZ signs and final Linear: out = probs @ (zsign @ wo) + bo ----
    zsign = (1.0 - 2.0 * bits.T).astype(np.float64)                          # (512,9)
    zw = zsign @ np.asarray(wo, np.float64)                                  # (512,A)
    zw_pad = np.zeros((DIM, OUT_LANES), np.float32)
    zw_pad[:, :action_shape] = zw
    bo_pad = np.zeros((1, OUT_LANES), np.float32)
    bo_pad[0, :action_shape] = np.asarray(bo, np.float32)[0]
    zw_pad = jnp.asarray(zw_pad, jnp.bfloat16)                # bf16 MXU path
    bo_pad = jnp.asarray(bo_pad)

    params = (w1p, b1p, w2p, b2p, wqp, bqp, bita, bitb, ea, eb, ucat, zw_pad,
              bo_pad, action_shape)

    # ---- run + verify against fp64 reference ------------------------------------
    def run_and_check(B, key_in):
        obs = jax.random.normal(key_in, (B,) + state_shape, jnp.float32)
        logits, _ = qnet_forward(obs, params)
        logits = np.asarray(jax.block_until_ready(logits))

        xf = np.asarray(obs.reshape(B, -1), dtype=np.float64)
        h = np.maximum(xf @ np.asarray(w1, np.float64) + np.asarray(b1, np.float64), 0.0)
        h = np.maximum(h @ np.asarray(w2, np.float64) + np.asarray(b2, np.float64), 0.0)
        ang = h @ np.asarray(wq, np.float64) + np.asarray(bq, np.float64)
        z = _ref_quantum_layer(ang, qweights)
        ref = z @ np.asarray(wo, np.float64) + np.asarray(bo, np.float64)

        assert logits.shape == (B, action_shape)
        err = float(np.max(np.abs(logits - ref)))
        assert np.allclose(logits, ref, atol=1.5e-2, rtol=1e-3), err

    run_and_check(2, keys[5])     # small batch, single grid step (demo shape)
    run_and_check(20, keys[6])    # padded batch, 2 grid steps (exercises tiling)
    print("KERNEL_OK")
</pallas_src>

<mosaic_0001>
module attributes {stable_mosaic.version = 11 : i64} {
  func.func @qnet_kernel(%arg0: i32, %arg1: memref<8x64xf32, #tpu.memory_space<vmem>>, %arg2: memref<64x128xf32, #tpu.memory_space<vmem>>, %arg3: memref<1x128xf32, #tpu.memory_space<vmem>>, %arg4: memref<128x128xf32, #tpu.memory_space<vmem>>, %arg5: memref<1x128xf32, #tpu.memory_space<vmem>>, %arg6: memref<128x16xf32, #tpu.memory_space<vmem>>, %arg7: memref<1x16xf32, #tpu.memory_space<vmem>>, %arg8: memref<4x16xf32, #tpu.memory_space<vmem>>, %arg9: memref<5x32xf32, #tpu.memory_space<vmem>>, %arg10: memref<16x512xbf16, #tpu.memory_space<vmem>>, %arg11: memref<32x512xbf16, #tpu.memory_space<vmem>>, %arg12: memref<512x1024xbf16, #tpu.memory_space<vmem>>, %arg13: memref<512x128xbf16, #tpu.memory_space<vmem>>, %arg14: memref<1x128xf32, #tpu.memory_space<vmem>>, %arg15: memref<8x128xf32, #tpu.memory_space<vmem>>) attributes {dimension_semantics = [#tpu.dimension_semantics<parallel>], iteration_bounds = array<i64: 1>, scalar_prefetch = 0 : i64, scratch_operands = 0 : i64, tpu.core_type = #tpu.core_type<tc>, window_params = [{transform_indices = @transform_0, window_bounds = array<i64: 8, 64>}, {pipeline_mode = #tpu.pipeline_mode<synchronous>, transform_indices = @transform_1, window_bounds = array<i64: 64, 128>}, {pipeline_mode = #tpu.pipeline_mode<synchronous>, transform_indices = @transform_2, window_bounds = array<i64: 1, 128>}, {pipeline_mode = #tpu.pipeline_mode<synchronous>, transform_indices = @transform_3, window_bounds = array<i64: 128, 128>}, {pipeline_mode = #tpu.pipeline_mode<synchronous>, transform_indices = @transform_4, window_bounds = array<i64: 1, 128>}, {pipeline_mode = #tpu.pipeline_mode<synchronous>, transform_indices = @transform_5, window_bounds = array<i64: 128, 16>}, {pipeline_mode = #tpu.pipeline_mode<synchronous>, transform_indices = @transform_6, window_bounds = array<i64: 1, 16>}, {pipeline_mode = #tpu.pipeline_mode<synchronous>, transform_indices = @transform_7, window_bounds = array<i64: 4, 16>}, {pipeline_mode = #tpu.pipeline_mode<synchronous>, transform_indices = @transform_8, window_bounds = array<i64: 5, 32>}, {pipeline_mode = #tpu.pipeline_mode<synchronous>, transform_indices = @transform_9, window_bounds = array<i64: 16, 512>}, {pipeline_mode = #tpu.pipeline_mode<synchronous>, transform_indices = @transform_10, window_bounds = array<i64: 32, 512>}, {pipeline_mode = #tpu.pipeline_mode<synchronous>, transform_indices = @transform_11, window_bounds = array<i64: 512, 1024>}, {pipeline_mode = #tpu.pipeline_mode<synchronous>, transform_indices = @transform_12, window_bounds = array<i64: 512, 128>}, {pipeline_mode = #tpu.pipeline_mode<synchronous>, transform_indices = @transform_13, window_bounds = array<i64: 1, 128>}, {transform_indices = @transform_14, window_bounds = array<i64: 8, 128>}]} {
    %c0 = arith.constant 0 : index
    %c0_0 = arith.constant 0 : index
    %0 = vector.load %arg1[%c0, %c0_0] : memref<8x64xf32, #tpu.memory_space<vmem>>, vector<8x64xf32>
    %c0_1 = arith.constant 0 : index
    %c0_2 = arith.constant 0 : index
    %1 = vector.load %arg2[%c0_1, %c0_2] : memref<64x128xf32, #tpu.memory_space<vmem>>, vector<64x128xf32>
    %cst = arith.constant dense<0.000000e+00> : vector<8x128xf32>
    %2 = tpu.matmul %0, %1, %cst {dimension_numbers = #tpu.dot_dimension_numbers<[1], [0], [0], [1], [0, 0, 1, 1], [], []>} : vector<8x64xf32>, vector<64x128xf32>, vector<8x128xf32> -> vector<8x128xf32>
    %c0_3 = arith.constant 0 : index
    %c0_4 = arith.constant 0 : index
    %3 = vector.load %arg3[%c0_3, %c0_4] : memref<1x128xf32, #tpu.memory_space<vmem>>, vector<1x128xf32>
    %4 = vector.broadcast %3 : vector<1x128xf32> to vector<8x128xf32>
    %5 = arith.addf %2, %4 : vector<8x128xf32>
    %cst_5 = arith.constant 0.000000e+00 : f32
    %6 = vector.broadcast %cst_5 : f32 to vector<8x128xf32>
    %7 = arith.maximumf %5, %6 : vector<8x128xf32>
    %c0_6 = arith.constant 0 : index
    %c0_7 = arith.constant 0 : index
    %8 = vector.load %arg4[%c0_6, %c0_7] : memref<128x128xf32, #tpu.memory_space<vmem>>, vector<128x128xf32>
    %cst_8 = arith.constant dense<0.000000e+00> : vector<8x128xf32>
    %9 = tpu.matmul %7, %8, %cst_8 {dimension_numbers = #tpu.dot_dimension_numbers<[1], [0], [0], [1], [0, 0, 1, 1], [], []>} : vector<8x128xf32>, vector<128x128xf32>, vector<8x128xf32> -> vector<8x128xf32>
    %c0_9 = arith.constant 0 : index
    %c0_10 = arith.constant 0 : index
    %10 = vector.load %arg5[%c0_9, %c0_10] : memref<1x128xf32, #tpu.memory_space<vmem>>, vector<1x128xf32>
    %11 = vector.broadcast %10 : vector<1x128xf32> to vector<8x128xf32>
    %12 = arith.addf %9, %11 : vector<8x128xf32>
    %cst_11 = arith.constant 0.000000e+00 : f32
    %13 = vector.broadcast %cst_11 : f32 to vector<8x128xf32>
    %14 = arith.maximumf %12, %13 : vector<8x128xf32>
    %c0_12 = arith.constant 0 : index
    %c0_13 = arith.constant 0 : index
    %15 = vector.load %arg6[%c0_12, %c0_13] : memref<128x16xf32, #tpu.memory_space<vmem>>, vector<128x16xf32>
    %cst_14 = arith.constant dense<0.000000e+00> : vector<8x16xf32>
    %16 = tpu.matmul %14, %15, %cst_14 {dimension_numbers = #tpu.dot_dimension_numbers<[1], [0], [0], [1], [0, 0, 1, 1], [], []>} : vector<8x128xf32>, vector<128x16xf32>, vector<8x16xf32> -> vector<8x16xf32>
    %c0_15 = arith.constant 0 : index
    %c0_16 = arith.constant 0 : index
    %17 = vector.load %arg7[%c0_15, %c0_16] : memref<1x16xf32, #tpu.memory_space<vmem>>, vector<1x16xf32>
    %18 = vector.broadcast %17 : vector<1x16xf32> to vector<8x16xf32>
    %19 = arith.addf %16, %18 : vector<8x16xf32>
    %cst_17 = arith.constant 5.000000e-01 : f32
    %20 = vector.broadcast %cst_17 : f32 to vector<8x16xf32>
    %21 = arith.mulf %19, %20 : vector<8x16xf32>
    %22 = math.cos %21 : vector<8x16xf32>
    %cst_18 = arith.constant 5.000000e-01 : f32
    %23 = vector.broadcast %cst_18 : f32 to vector<8x16xf32>
    %24 = arith.mulf %19, %23 : vector<8x16xf32>
    %25 = math.sin %24 : vector<8x16xf32>
    %26 = arith.subf %25, %22 : vector<8x16xf32>
    %c0_19 = arith.constant 0 : index
    %c0_20 = arith.constant 0 : index
    %27 = vector.load %arg8[%c0_19, %c0_20] : memref<4x16xf32, #tpu.memory_space<vmem>>, vector<4x16xf32>
    %c0_21 = arith.constant 0 : index
    %c0_22 = arith.constant 0 : index
    %28 = vector.load %arg9[%c0_21, %c0_22] : memref<5x32xf32, #tpu.memory_space<vmem>>, vector<5x32xf32>
    %29 = vector.extract_strided_slice %22 {offsets = [0, 0], sizes = [8, 1], strides = [1, 1]} : vector<8x16xf32> to vector<8x1xf32>
    %30 = vector.extract_strided_slice %26 {offsets = [0, 0], sizes = [8, 1], strides = [1, 1]} : vector<8x16xf32> to vector<8x1xf32>
    %31 = vector.extract_strided_slice %27 {offsets = [0, 0], sizes = [1, 16], strides = [1, 1]} : vector<4x16xf32> to vector<1x16xf32>
    %32 = vector.broadcast %30 : vector<8x1xf32> to vector<8x16xf32>
    %33 = vector.broadcast %31 : vector<1x16xf32> to vector<8x16xf32>
    %34 = arith.mulf %32, %33 : vector<8x16xf32>
    %35 = vector.broadcast %29 : vector<8x1xf32> to vector<8x16xf32>
    %36 = arith.addf %35, %34 : vector<8x16xf32>
    %37 = vector.extract_strided_slice %22 {offsets = [0, 1], sizes = [8, 1], strides = [1, 1]} : vector<8x16xf32> to vector<8x1xf32>
    %38 = vector.extract_strided_slice %26 {offsets = [0, 1], sizes = [8, 1], strides = [1, 1]} : vector<8x16xf32> to vector<8x1xf32>
    %39 = vector.extract_strided_slice %27 {offsets = [1, 0], sizes = [1, 16], strides = [1, 1]} : vector<4x16xf32> to vector<1x16xf32>
    %40 = vector.broadcast %38 : vector<8x1xf32> to vector<8x16xf32>
    %41 = vector.broadcast %39 : vector<1x16xf32> to vector<8x16xf32>
    %42 = arith.mulf %40, %41 : vector<8x16xf32>
    %43 = vector.broadcast %37 : vector<8x1xf32> to vector<8x16xf32>
    %44 = arith.addf %43, %42 : vector<8x16xf32>
    %45 = arith.mulf %36, %44 : vector<8x16xf32>
    %46 = vector.extract_strided_slice %22 {offsets = [0, 2], sizes = [8, 1], strides = [1, 1]} : vector<8x16xf32> to vector<8x1xf32>
    %47 = vector.extract_strided_slice %26 {offsets = [0, 2], sizes = [8, 1], strides = [1, 1]} : vector<8x16xf32> to vector<8x1xf32>
    %48 = vector.extract_strided_slice %27 {offsets = [2, 0], sizes = [1, 16], strides = [1, 1]} : vector<4x16xf32> to vector<1x16xf32>
    %49 = vector.broadcast %47 : vector<8x1xf32> to vector<8x16xf32>
    %50 = vector.broadcast %48 : vector<1x16xf32> to vector<8x16xf32>
    %51 = arith.mulf %49, %50 : vector<8x16xf32>
    %52 = vector.broadcast %46 : vector<8x1xf32> to vector<8x16xf32>
    %53 = arith.addf %52, %51 : vector<8x16xf32>
    %54 = arith.mulf %45, %53 : vector<8x16xf32>
    %55 = vector.extract_strided_slice %22 {offsets = [0, 3], sizes = [8, 1], strides = [1, 1]} : vector<8x16xf32> to vector<8x1xf32>
    %56 = vector.extract_strided_slice %26 {offsets = [0, 3], sizes = [8, 1], strides = [1, 1]} : vector<8x16xf32> to vector<8x1xf32>
    %57 = vector.extract_strided_slice %27 {offsets = [3, 0], sizes = [1, 16], strides = [1, 1]} : vector<4x16xf32> to vector<1x16xf32>
    %58 = vector.broadcast %56 : vector<8x1xf32> to vector<8x16xf32>
    %59 = vector.broadcast %57 : vector<1x16xf32> to vector<8x16xf32>
    %60 = arith.mulf %58, %59 : vector<8x16xf32>
    %61 = vector.broadcast %55 : vector<8x1xf32> to vector<8x16xf32>
    %62 = arith.addf %61, %60 : vector<8x16xf32>
    %63 = arith.mulf %54, %62 : vector<8x16xf32>
    %64 = vector.extract_strided_slice %22 {offsets = [0, 4], sizes = [8, 1], strides = [1, 1]} : vector<8x16xf32> to vector<8x1xf32>
    %65 = vector.extract_strided_slice %26 {offsets = [0, 4], sizes = [8, 1], strides = [1, 1]} : vector<8x16xf32> to vector<8x1xf32>
    %66 = vector.extract_strided_slice %28 {offsets = [0, 0], sizes = [1, 32], strides = [1, 1]} : vector<5x32xf32> to vector<1x32xf32>
    %67 = vector.broadcast %65 : vector<8x1xf32> to vector<8x32xf32>
    %68 = vector.broadcast %66 : vector<1x32xf32> to vector<8x32xf32>
    %69 = arith.mulf %67, %68 : vector<8x32xf32>
    %70 = vector.broadcast %64 : vector<8x1xf32> to vector<8x32xf32>
    %71 = arith.addf %70, %69 : vector<8x32xf32>
    %72 = vector.extract_strided_slice %22 {offsets = [0, 5], sizes = [8, 1], strides = [1, 1]} : vector<8x16xf32> to vector<8x1xf32>
    %73 = vector.extract_strided_slice %26 {offsets = [0, 5], sizes = [8, 1], strides = [1, 1]} : vector<8x16xf32> to vector<8x1xf32>
    %74 = vector.extract_strided_slice %28 {offsets = [1, 0], sizes = [1, 32], strides = [1, 1]} : vector<5x32xf32> to vector<1x32xf32>
    %75 = vector.broadcast %73 : vector<8x1xf32> to vector<8x32xf32>
    %76 = vector.broadcast %74 : vector<1x32xf32> to vector<8x32xf32>
    %77 = arith.mulf %75, %76 : vector<8x32xf32>
    %78 = vector.broadcast %72 : vector<8x1xf32> to vector<8x32xf32>
    %79 = arith.addf %78, %77 : vector<8x32xf32>
    %80 = arith.mulf %71, %79 : vector<8x32xf32>
    %81 = vector.extract_strided_slice %22 {offsets = [0, 6], sizes = [8, 1], strides = [1, 1]} : vector<8x16xf32> to vector<8x1xf32>
    %82 = vector.extract_strided_slice %26 {offsets = [0, 6], sizes = [8, 1], strides = [1, 1]} : vector<8x16xf32> to vector<8x1xf32>
    %83 = vector.extract_strided_slice %28 {offsets = [2, 0], sizes = [1, 32], strides = [1, 1]} : vector<5x32xf32> to vector<1x32xf32>
    %84 = vector.broadcast %82 : vector<8x1xf32> to vector<8x32xf32>
    %85 = vector.broadcast %83 : vector<1x32xf32> to vector<8x32xf32>
    %86 = arith.mulf %84, %85 : vector<8x32xf32>
    %87 = vector.broadcast %81 : vector<8x1xf32> to vector<8x32xf32>
    %88 = arith.addf %87, %86 : vector<8x32xf32>
    %89 = arith.mulf %80, %88 : vector<8x32xf32>
    %90 = vector.extract_strided_slice %22 {offsets = [0, 7], sizes = [8, 1], strides = [1, 1]} : vector<8x16xf32> to vector<8x1xf32>
    %91 = vector.extract_strided_slice %26 {offsets = [0, 7], sizes = [8, 1], strides = [1, 1]} : vector<8x16xf32> to vector<8x1xf32>
    %92 = vector.extract_strided_slice %28 {offsets = [3, 0], sizes = [1, 32], strides = [1, 1]} : vector<5x32xf32> to vector<1x32xf32>
    %93 = vector.broadcast %91 : vector<8x1xf32> to vector<8x32xf32>
    %94 = vector.broadcast %92 : vector<1x32xf32> to vector<8x32xf32>
    %95 = arith.mulf %93, %94 : vector<8x32xf32>
    %96 = vector.broadcast %90 : vector<8x1xf32> to vector<8x32xf32>
    %97 = arith.addf %96, %95 : vector<8x32xf32>
    %98 = arith.mulf %89, %97 : vector<8x32xf32>
    %99 = vector.extract_strided_slice %22 {offsets = [0, 8], sizes = [8, 1], strides = [1, 1]} : vector<8x16xf32> to vector<8x1xf32>
    %100 = vector.extract_strided_slice %26 {offsets = [0, 8], sizes = [8, 1], strides = [1, 1]} : vector<8x16xf32> to vector<8x1xf32>
    %101 = vector.extract_strided_slice %28 {offsets = [4, 0], sizes = [1, 32], strides = [1, 1]} : vector<5x32xf32> to vector<1x32xf32>
    %102 = vector.broadcast %100 : vector<8x1xf32> to vector<8x32xf32>
    %103 = vector.broadcast %101 : vector<1x32xf32> to vector<8x32xf32>
    %104 = arith.mulf %102, %103 : vector<8x32xf32>
    %105 = vector.broadcast %99 : vector<8x1xf32> to vector<8x32xf32>
    %106 = arith.addf %105, %104 : vector<8x32xf32>
    %107 = arith.mulf %98, %106 : vector<8x32xf32>
    %108 = arith.truncf %63 : vector<8x16xf32> to vector<8x16xbf16>
    %c0_23 = arith.constant 0 : index
    %c0_24 = arith.constant 0 : index
    %109 = vector.load %arg10[%c0_23, %c0_24] : memref<16x512xbf16, #tpu.memory_space<vmem>>, vector<16x512xbf16>
    %cst_25 = arith.constant dense<0.000000e+00> : vector<8x512xf32>
    %110 = tpu.matmul %108, %109, %cst_25 {dimension_numbers = #tpu.dot_dimension_numbers<[1], [0], [0], [1], [0, 0, 1, 1], [], []>} : vector<8x16xbf16>, vector<16x512xbf16>, vector<8x512xf32> -> vector<8x512xf32>
    %111 = arith.truncf %107 : vector<8x32xf32> to vector<8x32xbf16>
    %c0_26 = arith.constant 0 : index
    %c0_27 = arith.constant 0 : index
    %112 = vector.load %arg11[%c0_26, %c0_27] : memref<32x512xbf16, #tpu.memory_space<vmem>>, vector<32x512xbf16>
    %cst_28 = arith.constant dense<0.000000e+00> : vector<8x512xf32>
    %113 = tpu.matmul %111, %112, %cst_28 {dimension_numbers = #tpu.dot_dimension_numbers<[1], [0], [0], [1], [0, 0, 1, 1], [], []>} : vector<8x32xbf16>, vector<32x512xbf16>, vector<8x512xf32> -> vector<8x512xf32>
    %114 = arith.mulf %110, %113 : vector<8x512xf32>
    %115 = arith.truncf %114 : vector<8x512xf32> to vector<8x512xbf16>
    %c0_29 = arith.constant 0 : index
    %c0_30 = arith.constant 0 : index
    %116 = vector.load %arg12[%c0_29, %c0_30] : memref<512x1024xbf16, #tpu.memory_space<vmem>>, vector<512x1024xbf16>
    %cst_31 = arith.constant dense<0.000000e+00> : vector<8x1024xf32>
    %117 = tpu.matmul %115, %116, %cst_31 {dimension_numbers = #tpu.dot_dimension_numbers<[1], [0], [0], [1], [0, 0, 1, 1], [], []>} : vector<8x512xbf16>, vector<512x1024xbf16>, vector<8x1024xf32> -> vector<8x1024xf32>
    %118 = arith.mulf %117, %117 : vector<8x1024xf32>
    %119 = vector.extract_strided_slice %118 {offsets = [0, 0], sizes = [8, 512], strides = [1, 1]} : vector<8x1024xf32> to vector<8x512xf32>
    %120 = vector.extract_strided_slice %118 {offsets = [0, 512], sizes = [8, 512], strides = [1, 1]} : vector<8x1024xf32> to vector<8x512xf32>
    %121 = arith.addf %119, %120 : vector<8x512xf32>
    %122 = arith.truncf %121 : vector<8x512xf32> to vector<8x512xbf16>
    %c0_32 = arith.constant 0 : index
    %c0_33 = arith.constant 0 : index
    %123 = vector.load %arg13[%c0_32, %c0_33] : memref<512x128xbf16, #tpu.memory_space<vmem>>, vector<512x128xbf16>
    %cst_34 = arith.constant dense<0.000000e+00> : vector<8x128xf32>
    %124 = tpu.matmul %122, %123, %cst_34 {dimension_numbers = #tpu.dot_dimension_numbers<[1], [0], [0], [1], [0, 0, 1, 1], [], []>} : vector<8x512xbf16>, vector<512x128xbf16>, vector<8x128xf32> -> vector<8x128xf32>
    %c0_35 = arith.constant 0 : index
    %c0_36 = arith.constant 0 : index
    %125 = vector.load %arg14[%c0_35, %c0_36] : memref<1x128xf32, #tpu.memory_space<vmem>>, vector<1x128xf32>
    %126 = vector.broadcast %125 : vector<1x128xf32> to vector<8x128xf32>
    %127 = arith.addf %124, %126 : vector<8x128xf32>
    %c0_37 = arith.constant 0 : index
    %c0_38 = arith.constant 0 : index
    %128 = vector.load %arg15[%c0_37, %c0_38] : memref<8x128xf32, #tpu.memory_space<vmem>>, vector<8x128xf32>
    tpu.vector_store %arg15[%c0_37, %c0_38], %127 {strides = array<i32>} : memref<8x128xf32, #tpu.memory_space<vmem>>, vector<8x128xf32>,
    return
  }
  func.func @transform_0(%arg0: i32) -> (i32, i32) {
    %c0_i32 = arith.constant 0 : i32
    %c0_i32_0 = arith.constant 0 : i32
    return %arg0, %c0_i32 : i32, i32
  }
  func.func @transform_1(%arg0: i32) -> (i32, i32) {
    %c0_i32 = arith.constant 0 : i32
    %c0_i32_0 = arith.constant 0 : i32
    %c0_i32_1 = arith.constant 0 : i32
    return %c0_i32, %c0_i32_0 : i32, i32
  }
  func.func @transform_2(%arg0: i32) -> (i32, i32) {
    %c0_i32 = arith.constant 0 : i32
    %c0_i32_0 = arith.constant 0 : i32
    %c0_i32_1 = arith.constant 0 : i32
    return %c0_i32, %c0_i32_0 : i32, i32
  }
  func.func @transform_3(%arg0: i32) -> (i32, i32) {
    %c0_i32 = arith.constant 0 : i32
    %c0_i32_0 = arith.constant 0 : i32
    %c0_i32_1 = arith.constant 0 : i32
    return %c0_i32, %c0_i32_0 : i32, i32
  }
  func.func @transform_4(%arg0: i32) -> (i32, i32) {
    %c0_i32 = arith.constant 0 : i32
    %c0_i32_0 = arith.constant 0 : i32
    %c0_i32_1 = arith.constant 0 : i32
    return %c0_i32, %c0_i32_0 : i32, i32
  }
  func.func @transform_5(%arg0: i32) -> (i32, i32) {
    %c0_i32 = arith.constant 0 : i32
    %c0_i32_0 = arith.constant 0 : i32
    %c0_i32_1 = arith.constant 0 : i32
    return %c0_i32, %c0_i32_0 : i32, i32
  }
  func.func @transform_6(%arg0: i32) -> (i32, i32) {
    %c0_i32 = arith.constant 0 : i32
    %c0_i32_0 = arith.constant 0 : i32
    %c0_i32_1 = arith.constant 0 : i32
    return %c0_i32, %c0_i32_0 : i32, i32
  }
  func.func @transform_7(%arg0: i32) -> (i32, i32) {
    %c0_i32 = arith.constant 0 : i32
    %c0_i32_0 = arith.constant 0 : i32
    %c0_i32_1 = arith.constant 0 : i32
    return %c0_i32, %c0_i32_0 : i32, i32
  }
  func.func @transform_8(%arg0: i32) -> (i32, i32) {
    %c0_i32 = arith.constant 0 : i32
    %c0_i32_0 = arith.constant 0 : i32
    %c0_i32_1 = arith.constant 0 : i32
    return %c0_i32, %c0_i32_0 : i32, i32
  }
  func.func @transform_9(%arg0: i32) -> (i32, i32) {
    %c0_i32 = arith.constant 0 : i32
    %c0_i32_0 = arith.constant 0 : i32
    %c0_i32_1 = arith.constant 0 : i32
    return %c0_i32, %c0_i32_0 : i32, i32
  }
  func.func @transform_10(%arg0: i32) -> (i32, i32) {
    %c0_i32 = arith.constant 0 : i32
    %c0_i32_0 = arith.constant 0 : i32
    %c0_i32_1 = arith.constant 0 : i32
    return %c0_i32, %c0_i32_0 : i32, i32
  }
  func.func @transform_11(%arg0: i32) -> (i32, i32) {
    %c0_i32 = arith.constant 0 : i32
    %c0_i32_0 = arith.constant 0 : i32
    %c0_i32_1 = arith.constant 0 : i32
    return %c0_i32, %c0_i32_0 : i32, i32
  }
  func.func @transform_12(%arg0: i32) -> (i32, i32) {
    %c0_i32 = arith.constant 0 : i32
    %c0_i32_0 = arith.constant 0 : i32
    %c0_i32_1 = arith.constant 0 : i32
    return %c0_i32, %c0_i32_0 : i32, i32
  }
  func.func @transform_13(%arg0: i32) -> (i32, i32) {
    %c0_i32 = arith.constant 0 : i32
    %c0_i32_0 = arith.constant 0 : i32
    %c0_i32_1 = arith.constant 0 : i32
    return %c0_i32, %c0_i32_0 : i32, i32
  }
  func.func @transform_14(%arg0: i32) -> (i32, i32) {
    %c0_i32 = arith.constant 0 : i32
    %c0_i32_0 = arith.constant 0 : i32
    return %arg0, %c0_i32 : i32, i32
  }
}

</mosaic_0001>

<bundles_post_ra>
// kernel: tpu_custom_call.1
= control target key start
LH: loop header
LB: loop body
LE: loop exit
PB: predicated region body
PF: predicated region fallthrough
CT: control target
= control target key end

     0   :  { %19 = vsyncpa [#allocation3], 0  ;;  %s4541_s0 = inlined_call_operand.hbm [shape: f32[8,64], index: 0, kind: input, shape index: {}]   ;;  %s4542_s1 = inlined_call_operand.hbm [shape: f32[64,128], index: 1, kind: input, shape index: {}]   ;;  %s4543_s2 = inlined_call_operand.vmem [shape: f32[1,128], index: 2, kind: input, shape index: {}]   ;;  %s4544_s3 = inlined_call_operand.vmem [shape: f32[128,128], index: 3, kind: input, shape index: {}]   ;;  %s4545_s4 = inlined_call_operand.vmem [shape: f32[1,128], index: 4, kind: input, shape index: {}]   ;;  %s4546_s5 = inlined_call_operand.vmem [shape: f32[128,16], index: 5, kind: input, shape index: {}]   ;;  %s4547_s6 = inlined_call_operand.hbm [shape: f32[1,16], index: 6, kind: input, shape index: {}]   ;;  %s4548_s7 = inlined_call_operand.hbm [shape: f32[4,16], index: 7, kind: input, shape index: {}]   ;;  %s4549_s8 = inlined_call_operand.vmem [shape: f32[5,32], index: 8, kind: input, shape index: {}]   ;;  %s4550_s9 = inlined_call_operand.vmem [shape: bf16[16,512], index: 9, kind: input, shape index: {}]   ;;  %s4551_s10 = inlined_call_operand.hbm [shape: bf16[32,512], index: 10, kind: input, shape index: {}]   ;;  %s4552_s11 = inlined_call_operand.hbm [shape: bf16[512,1024], index: 11, kind: input, shape index: {}]   ;;  %s4553_s12 = inlined_call_operand.hbm [shape: bf16[512,128], index: 12, kind: input, shape index: {}]   ;;  %s4554_s13 = inlined_call_operand.vmem [shape: f32[1,128], index: 13, kind: input, shape index: {}]   ;;  %s4555_s14 = inlined_call_operand.hbm [shape: f32[8,128], index: 14, kind: output, shape index: {}]  }
   0x1   :  { %20 = vsyncpa [#allocation6], 0 }
   0x2   :  { %21 = vsyncpa [#allocation9], 0 }
   0x3   :  { %22 = vsyncpa [#allocation12], 0 }
   0x4   :  { %23 = vsyncpa [#allocation4], 0  ;;  %s4123_s29 = smov [#allocation5]   ;;  %s3937_s17 = scalar_lea.hbm %s4542_s1, 1024 }
   0x5   :  { %s39_s30 = sshll.u32 %s4123_s29, 4  ;;  %p3938_p0 = scmp.ne.s32.totalorder %s4542_s1, %s3937_s17  ;;  %s40_s30 = int_to_ptr.vmem [resolvable:$true] %s39_s30 }
   0x6   :  { %p3941_p1 = scmp.lt.u32.totalorder %s3937_s17, %s4542_s1 }
   0x8   :  { %p3943_p2 = pnand %p3941_p1, %p3938_p0 }
   0xa   :  { %3946 = shalt.err (!%p3943_p2)
}
   0xb   :  { %s3947_s22 = scalar_lea.vmem %s40_s30, 1024  ;;  %p3952_p4 = scmp.lt.s32.totalorder %s40_s30, %s40_s30 }
   0xc   :  { %p3948_p3 = scmp.ne.s32.totalorder %s40_s30, %s3947_s22  ;;  %p3953_p5 = scmp.lt.s32.totalorder %s3947_s22, %s3947_s22 }
   0xe   :  { %p3954_p6 = por %p3953_p5, %p3952_p4 }
  0x10   :  { %p3955_p7 = pnand %p3954_p6, %p3948_p3 }
  0x12   :  { %3958 = shalt.err (!%p3955_p7)
}
  0x13   :  { %s4124_s23 = smov 128   ;;  %s4125_s24 = smov 8  }
  0x14   :  { %45 = dma.hbm_to_vmem [thread:$0]  %s4542_s1, 1024, %s40_s30, [#allocation6], %s4124_s23, %s4124_s23, %s4125_s24  }
  0x15   :  { %s4126_s27 = smov [#allocation8]   ;;  %s4127_s29 = smov [#allocation11]  }
  0x16   :  { %s70_s28 = sshll.u32 %s4126_s27, 4  ;;  %s95_s15 = sshll.u32 %s4127_s29, 4  ;;  %s71_s28 = int_to_ptr.vmem [resolvable:$true] %s70_s28  ;;  %s96_s15 = int_to_ptr.vmem [resolvable:$true] %s95_s15 }
  0x17   :  { %s3959_s18 = scalar_lea.hbm %s4548_s7, 64 }
  0x18   :  { %p3960_p8 = scmp.ne.s32.totalorder %s4548_s7, %s3959_s18  ;;  %p3963_p9 = scmp.lt.u32.totalorder %s3959_s18, %s4548_s7 }
  0x1a   :  { %p3965_p10 = pnand %p3963_p9, %p3960_p8 }
  0x1c   :  { %3968 = shalt.err (!%p3965_p10)
}
  0x1d   :  { %s3969_s1 = scalar_lea.vmem %s71_s28, 64  ;;  %p3974_p12 = scmp.lt.s32.totalorder %s71_s28, %s71_s28 }
  0x1e   :  { %p3970_p11 = scmp.ne.s32.totalorder %s71_s28, %s3969_s1  ;;  %p3975_p13 = scmp.lt.s32.totalorder %s3969_s1, %s3969_s1 }
  0x20   :  { %p3976_p0 = por %p3975_p13, %p3974_p12 }
  0x22   :  { %p3977_p1 = pnand %p3976_p0, %p3970_p11 }
  0x24   :  { %3980 = shalt.err (!%p3977_p1)
}
  0x25   :  { %73 = dma.hbm_to_vmem [thread:$0]  %s4548_s7, 64, %s71_s28, [#allocation9]  }
  0x26   :  { %s3981_s26 = scalar_lea.hbm %s4552_s11, 32768 }
  0x27   :  { %p3982_p2 = scmp.ne.s32.totalorder %s4552_s11, %s3981_s26  ;;  %p3985_p3 = scmp.lt.u32.totalorder %s3981_s26, %s4552_s11 }
  0x29   :  { %p3987_p4 = pnand %p3985_p3, %p3982_p2 }
  0x2b   :  { %3990 = shalt.err (!%p3987_p4)
}
  0x2c   :  { %s3991_s18 = scalar_lea.vmem %s96_s15, 32768  ;;  %p3996_p6 = scmp.lt.s32.totalorder %s96_s15, %s96_s15 }
  0x2d   :  { %p3992_p5 = scmp.ne.s32.totalorder %s96_s15, %s3991_s18  ;;  %p3997_p7 = scmp.lt.s32.totalorder %s3991_s18, %s3991_s18 }
  0x2f   :  { %p3998_p8 = por %p3997_p7, %p3996_p6 }
  0x31   :  { %p3999_p9 = pnand %p3998_p8, %p3992_p5 }
  0x33   :  { %4002 = shalt.err (!%p3999_p9)
}
  0x34   :  { %s4128_s7 = smov 512   ;;  %s4129_s28 = smov 32  }
  0x35   :  { %101 = dma.hbm_to_vmem [thread:$0]  %s4552_s11, 32768, %s96_s15, [#allocation12], %s4128_s7, %s4128_s7, %s4129_s28  }
  0x36   :  { %s4130_s21 = smov [#allocation2]   ;;  %s4131_s1 = smov [#allocation7]  }
  0x37   :  { %s30_s22 = sshll.u32 %s4130_s21, 4  ;;  %s60_s30 = sshll.u32 %s4131_s1, 4  ;;  %s31_s22 = int_to_ptr.vmem [resolvable:$true] %s30_s22  ;;  %s61_s30 = int_to_ptr.vmem [resolvable:$true] %s60_s30 }
  0x38   :  { %s4003_s25 = scalar_lea.hbm %s4541_s0, 128 }
  0x39   :  { %p4004_p10 = scmp.ne.s32.totalorder %s4541_s0, %s4003_s25  ;;  %p4007_p11 = scmp.lt.u32.totalorder %s4003_s25, %s4541_s0 }
  0x3b   :  { %p4009_p12 = pnand %p4007_p11, %p4004_p10 }
  0x3d   :  { %4012 = shalt.err (!%p4009_p12)
}
  0x3e   :  { %s4013_s11 = scalar_lea.vmem %s31_s22, 128  ;;  %p4018_p0 = scmp.lt.s32.totalorder %s31_s22, %s31_s22 }
  0x3f   :  { %p4014_p13 = scmp.ne.s32.totalorder %s31_s22, %s4013_s11  ;;  %p4019_p1 = scmp.lt.s32.totalorder %s4013_s11, %s4013_s11 }
  0x41   :  { %p4020_p2 = por %p4019_p1, %p4018_p0 }
  0x43   :  { %p4021_p3 = pnand %p4020_p2, %p4014_p13 }
  0x45   :  { %4024 = shalt.err (!%p4021_p3)
}
  0x46   :  { %33 = dma.hbm_to_vmem [thread:$0]  %s4541_s0, 128, %s31_s22, [#allocation3]  }
  0x47   :  { %s4025_s28 = scalar_lea.hbm %s4547_s6, 16 }
  0x48   :  { %p4026_p4 = scmp.ne.s32.totalorder %s4547_s6, %s4025_s28  ;;  %p4029_p5 = scmp.lt.u32.totalorder %s4025_s28, %s4547_s6 }
  0x4a   :  { %p4031_p6 = pnand %p4029_p5, %p4026_p4 }
  0x4c   :  { %4034 = shalt.err (!%p4031_p6)
}
  0x4d   :  { %s4035_s23 = scalar_lea.vmem %s61_s30, 16  ;;  %s4039_s24 = scalar_lea.vmem %s61_s30, 32 }
  0x4e   :  { %p4036_p7 = scmp.ne.s32.totalorder %s61_s30, %s4035_s23  ;;  %p4040_p8 = scmp.lt.s32.totalorder %s61_s30, %s61_s30 }
  0x4f   :  { %p4041_p9 = scmp.lt.s32.totalorder %s4039_s24, %s4035_s23 }
  0x51   :  { %p4042_p10 = por %p4041_p9, %p4040_p8 }
  0x53   :  { %p4043_p11 = pnand %p4042_p10, %p4036_p7 }
  0x55   :  { %4046 = shalt.err (!%p4043_p11)
}
  0x56   :  { %63 = dma.hbm_to_vmem [thread:$0]  %s4547_s6, 16, %s61_s30, [#allocation6]  }
  0x57   :  { %s4132_s25 = smov [#allocation10]   ;;  %s4047_s16 = scalar_lea.hbm %s4551_s10, 1024 }
  0x58   :  { %s83_s26 = sshll.u32 %s4132_s25, 4  ;;  %p4048_p12 = scmp.ne.s32.totalorder %s4551_s10, %s4047_s16  ;;  %s84_s26 = int_to_ptr.vmem [resolvable:$true] %s83_s26 }
  0x59   :  { %p4051_p13 = scmp.lt.u32.totalorder %s4047_s16, %s4551_s10 }
  0x5b   :  { %p4053_p0 = pnand %p4051_p13, %p4048_p12 }
  0x5d   :  { %4056 = shalt.err (!%p4053_p0)
}
  0x5e   :  { %s4057_s7 = scalar_lea.vmem %s84_s26, 1024  ;;  %p4062_p2 = scmp.lt.s32.totalorder %s84_s26, %s84_s26 }
  0x5f   :  { %p4058_p1 = scmp.ne.s32.totalorder %s84_s26, %s4057_s7  ;;  %p4063_p3 = scmp.lt.s32.totalorder %s4057_s7, %s4057_s7 }
  0x61   :  { %p4064_p4 = por %p4063_p3, %p4062_p2 }
  0x63   :  { %p4065_p5 = pnand %p4064_p4, %p4058_p1 }
  0x65   :  { %4068 = shalt.err (!%p4065_p5)
}
  0x66   :  { %s4133_s6 = smov 256   ;;  %s4134_s30 = smov 16  }
  0x67   :  { %89 = dma.hbm_to_vmem [thread:$0]  %s4551_s10, 1024, %s84_s26, [#allocation9], %s4133_s6, %s4133_s6, %s4134_s30  }
  0x68   :  { %s4135_s20 = smov [#allocation13]   ;;  %s4069_s24 = scalar_lea.hbm %s4553_s12, 4096 }
  0x69   :  { %s107_s21 = sshll.u32 %s4135_s20, 4  ;;  %p4070_p6 = scmp.ne.s32.totalorder %s4553_s12, %s4069_s24  ;;  %s108_s21 = int_to_ptr.vmem [resolvable:$true] %s107_s21 }
  0x6a   :  { %p4073_p7 = scmp.lt.u32.totalorder %s4069_s24, %s4553_s12 }
  0x6c   :  { %p4075_p8 = pnand %p4073_p7, %p4070_p6 }
  0x6e   :  { %4078 = shalt.err (!%p4075_p8)
}
  0x6f   :  { %s4079_s29 = scalar_lea.vmem %s108_s21, 4096  ;;  %p4084_p10 = scmp.lt.s32.totalorder %s108_s21, %s108_s21 }
  0x70   :  { %p4080_p9 = scmp.ne.s32.totalorder %s108_s21, %s4079_s29  ;;  %p4085_p11 = scmp.lt.s32.totalorder %s4079_s29, %s4079_s29 }
  0x72   :  { %p4086_p12 = por %p4085_p11, %p4084_p10 }
  0x74   :  { %p4087_p13 = pnand %p4086_p12, %p4080_p9 }
  0x76   :  { %4090 = shalt.err (!%p4087_p13)
}
  0x77   :  { %s4136_s10 = smov 64   ;;  %s4137_s26 = smov 4  }
  0x78   :  { %113 = dma.hbm_to_vmem [thread:$0]  %s4553_s12, 4096, %s108_s21, [#allocation12], %s4136_s10, %s4136_s10, %s4137_s26  }
  0x79   :  { %4113 = dma.done.wait [#allocation3], 128  }
  0x7a   :  { %4114 = vsyncadd [#allocation3], 4294967168 }
  0x7b   :  { %4115 = dma.done.wait [#allocation6], 1040  }
  0x7c   :  { %4116 = vsyncadd [#allocation6], 4294966256 }
  0x7d   :  { %4117 = dma.done.wait [#allocation9], 1088  }
  0x7e   :  { %4118 = vsyncadd [#allocation9], 4294966208 }
  0x7f   :  { %4119 = dma.done.wait [#allocation12], 36864  }
  0x80   :  { %4120 = vsyncadd [#allocation12], 4294930432  ;;  %v4138_v0 = vmov 0.0|0.0   ;;  %vm4139_vm0 = vmmov 0   ;;  %v4140_v1 = vmov 0.0   ;;  %v139_v2 = vld [vmem:[#allocation5] sm:$0xff] }
  0x81   :  { %3751 = vmatprep.subr.bf16.mxu0 %v4138_v0  ;;  %3678 = vmatprep.mubr.msk.f32.mxu0 %vm4139_vm0, %v4140_v1  ;;  %v140_v3 = vld [vmem:[#allocation5 + $0x8] sm:$0xff]  ;;  %v141_v4 = vld [vmem:[#allocation5 + $0x10] sm:$0xff]  ;;  %v142_v6 = vld [vmem:[#allocation5 + $0x18] sm:$0xff]  ;;  %vm154_vm1 = vcmask 523264   ;;  %s4156_s7 = smov [#allocation14]  }
  0x82   :  { %3763 = vmatprep.subr.bf16.mxu1 %v4138_v0  ;;  %3713 = vmatprep.mubr.msk.f32.mxu1 %vm4139_vm0, %v4140_v1  ;;  %v3752_v5 = vpack.c.bf16 %v140_v3, %v139_v2  ;;  %v3755_v7 = vpack.c.bf16 %v142_v6, %v141_v4  ;;  %v229_v8 = vld [vmem:[%s4544_s3] sm:$0xff]  ;;  %v230_v9 = vld [vmem:[%s4544_s3 + $0x8] sm:$0xff]  ;;  %v231_v10 = vld [vmem:[%s4544_s3 + $0x10] sm:$0xff]  ;;  %s3246_s6 = sshll.u32 %s4156_s7, 4  ;;  %s3247_s6 = int_to_ptr.vmem [resolvable:$true] %s3246_s6 }
  0x83   :  { %v143_v11 = vld [vmem:[#allocation5 + $0x20] sm:$0xff]  ;;  %v144_v12 = vld [vmem:[#allocation5 + $0x28] sm:$0xff]  ;;  %v3764_v13 = vpack.c.bf16 %v230_v9, %v229_v8  ;;  %v232_v14 = vld [vmem:[%s4544_s3 + $0x18] sm:$0xff]  ;;  %v4141_v9 = vmov 2   ;;  %s4091_s30 = scalar_lea.vmem %s3247_s6, 128  ;;  %p4096_p1 = scmp.lt.s32.totalorder %s3247_s6, %s3247_s6 }
  0x84   :  { %3753 = vmatpush3.bf16.msra.mxu0 %v3752_v5  ;;  %v145_v15 = vld [vmem:[#allocation5 + $0x30] sm:$0xff]  ;;  %v3767_v16 = vpack.c.bf16 %v232_v14, %v231_v10  ;;  %v3758_v17 = vpack.c.bf16 %v144_v12, %v143_v11  ;;  %v146_v18 = vld [vmem:[#allocation5 + $0x38] sm:$0xff]  ;;  %v234_v20 = vld [vmem:[%s4544_s3 + $0x28] sm:$0xff]  ;;  %3867 = vset.pattern.permute.xlu0 %v4141_v9  ;;  %v4142_v10 = vmov 0   ;;  %p4092_p0 = scmp.ne.s32.totalorder %s3247_s6, %s4091_s30  ;;  %p4097_p2 = scmp.lt.s32.totalorder %s4091_s30, %s4091_s30 }
  0x85   :  { %3754 = vmatprep.subr.bf16.mxu0 %v4138_v0  ;;  %3765 = vmatpush3.bf16.msra.mxu1 %v3764_v13  ;;  %v233_v19 = vld [vmem:[%s4544_s3 + $0x20] sm:$0xff]  ;;  %v235_v21 = vld [vmem:[%s4544_s3 + $0x30] sm:$0xff]  ;;  %v236_v22 = vld [vmem:[%s4544_s3 + $0x38] sm:$0xff]  ;;  %v3761_v24 = vpack.c.bf16 %v146_v18, %v145_v15 }
  0x86   :  { %3766 = vmatprep.subr.bf16.mxu1 %v4138_v0  ;;  %v3770_v23 = vpack.c.bf16 %v234_v20, %v233_v19  ;;  %v138_v25 = vld [vmem:[#allocation2] sm:$0xff]  ;;  %v238_v27 = vld [vmem:[%s4544_s3 + $0x48] sm:$0xff]  ;;  %v3773_v28 = vpack.c.bf16 %v236_v22, %v235_v21  ;;  %v239_v29 = vld [vmem:[%s4544_s3 + $0x50] sm:$0xff]  ;;  %3865 = vset.pattern.permute.xlu1 %v4142_v10  ;;  %p4098_p3 = por %p4097_p2, %p4096_p1 }
  0x87   :  { %v237_v26 = vld [vmem:[%s4544_s3 + $0x40] sm:$0xff]  ;;  %v240_v30 = vld [vmem:[%s4544_s3 + $0x58] sm:$0xff]  ;;  %v242_v33 = vld [vmem:[%s4544_s3 + $0x68] sm:$0xff] }
  0x88   :  { %3756 = vmatpush3.bf16.msra.mxu0 %v3755_v7  ;;  %v3776_v31 = vpack.c.bf16 %v238_v27, %v237_v26  ;;  %v241_v32 = vld [vmem:[%s4544_s3 + $0x60] sm:$0xff]  ;;  %v3779_v34 = vpack.c.bf16 %v240_v30, %v239_v29  ;;  %v243_v36 = vld [vmem:[%s4544_s3 + $0x70] sm:$0xff]  ;;  %v244_v37 = vld [vmem:[%s4544_s3 + $0x78] sm:$0xff]  ;;  %v4143_v26 = vmov 683565275   ;;  %p4099_p4 = pnand %p4098_p3, %p4092_p0 }
  0x89   :  { %3757 = vmatprep.subr.bf16.mxu0 %v4138_v0  ;;  %3768 = vmatpush3.bf16.msra.mxu1 %v3767_v16  ;;  %v3782_v35 = vpack.c.bf16 %v242_v33, %v241_v32  ;;  %v3785_v38 = vpack.c.bf16 %v244_v37, %v243_v36  ;;  %v323_v39 = vld [vmem:[%s4546_s5] sm:$0xff]  ;;  %v324_v40 = vld [vmem:[%s4546_s5 + $0x8] sm:$0xff]  ;;  %v325_v41 = vld [vmem:[%s4546_s5 + $0x10] sm:$0xff]  ;;  %v4147_v37 = vmov 920167782  }
  0x8a   :  { %3769 = vmatprep.subr.bf16.mxu1 %v4138_v0  ;;  %v3788_v42 = vpack.c.bf16 %v324_v40, %v323_v39  ;;  %v326_v43 = vld [vmem:[%s4546_s5 + $0x18] sm:$0xff]  ;;  %v327_v45 = vld [vmem:[%s4546_s5 + $0x20] sm:$0xff]  ;;  %v328_v46 = vld [vmem:[%s4546_s5 + $0x28] sm:$0xff]  ;;  %v4148_v40 = vmov 1326507024  }
  0x8b   :  { %v3791_v44 = vpack.c.bf16 %v326_v43, %v325_v41  ;;  %v3794_v47 = vpack.c.bf16 %v328_v46, %v327_v45  ;;  %v329_v48 = vld [vmem:[%s4546_s5 + $0x30] sm:$0xff]  ;;  %v330_v49 = vld [vmem:[%s4546_s5 + $0x38] sm:$0xff]  ;;  %v331_v51 = vld [vmem:[%s4546_s5 + $0x40] sm:$0xff] }
  0x8c   :  { %3759 = vmatpush3.bf16.msra.mxu0 %v3758_v17  ;;  %v3797_v50 = vpack.c.bf16 %v330_v49, %v329_v48  ;;  %v332_v52 = vld [vmem:[%s4546_s5 + $0x48] sm:$0xff]  ;;  %v333_v54 = vld [vmem:[%s4546_s5 + $0x50] sm:$0xff]  ;;  %v334_v55 = vld [vmem:[%s4546_s5 + $0x58] sm:$0xff] }
  0x8d   :  { %3760 = vmatprep.subr.bf16.mxu0 %v4138_v0  ;;  %3771 = vmatpush3.bf16.msra.mxu1 %v3770_v23  ;;  %v3800_v53 = vpack.c.bf16 %v332_v52, %v331_v51  ;;  %v3803_v56 = vpack.c.bf16 %v334_v55, %v333_v54  ;;  %v335_v57 = vld [vmem:[%s4546_s5 + $0x60] sm:$0xff]  ;;  %v336_v58 = vld [vmem:[%s4546_s5 + $0x68] sm:$0xff]  ;;  %v337_v2 = vld [vmem:[%s4546_s5 + $0x70] sm:$0xff] }
  0x8e   :  { %3772 = vmatprep.subr.bf16.mxu1 %v4138_v0  ;;  %v3806_v59 = vpack.c.bf16 %v336_v58, %v335_v57  ;;  %v3258_v60 = vld [vmem:[%s4543_s2] ss:$0 sm:$0xff]  ;;  %v338_v3 = vld [vmem:[%s4546_s5 + $0x78] sm:$0xff]  ;;  %v3261_v11 = vld [vmem:[#allocation7] ss:$0 sm:$0xff] }
  0x8f   :  { %v3809_v4 = vpack.c.bf16 %v338_v3, %v337_v2 }
  0x90   :  { %3762 = vmatpush3.bf16.msra.mxu0 %v3761_v24 }
  0x91   :  { %3787 = vmatprep.subr.bf16.mxu0 %v4138_v0  ;;  %3774 = vmatpush3.bf16.msra.mxu1 %v3773_v28  ;;  %v4144_v28 = vmov 2475754826  }
  0x92   :  { %3775 = vmatprep.subr.bf16.mxu1 %v4138_v0 }
  0x93   :  { %3679 = vmatmul.mubr.msk.f32.vlgmr.msra.gmra.mrb[0].mxu0 %vm154_vm1, %v138_v25 }
  0x94   :  { %3748 = vmatprep.mubr.msk.f32.mxu0 %vm4139_vm0, %v4140_v1  ;;  %3789 = vmatpush3.bf16.msra.mxu0 %v3788_v42 }
  0x95   :  { %3777 = vmatpush3.bf16.msra.mxu1 %v3776_v31  ;;  %3790 = vmatprep.subr.bf16.mxu0 %v4138_v0  ;;  %v4145_v31 = vmov 2131351028  }
  0x96   :  { %3778 = vmatprep.subr.bf16.mxu1 %v4138_v0 }
  0x98   :  { %3792 = vmatpush3.bf16.msra.mxu0 %v3791_v44 }
  0x99   :  { %3780 = vmatpush3.bf16.msra.mxu1 %v3779_v34  ;;  %3793 = vmatprep.subr.bf16.mxu0 %v4138_v0  ;;  %v4146_v34 = vmov 2102212464  }
  0x9a   :  { %3781 = vmatprep.subr.bf16.mxu1 %v4138_v0 }
  0x9c   :  { %3795 = vmatpush3.bf16.msra.mxu0 %v3794_v47 }
  0x9d   :  { %3783 = vmatpush3.bf16.msra.mxu1 %v3782_v35  ;;  %3796 = vmatprep.subr.bf16.mxu0 %v4138_v0 }
  0x9e   :  { %3784 = vmatprep.subr.bf16.mxu1 %v4138_v0 }
  0xa0   :  { %3798 = vmatpush3.bf16.msra.mxu0 %v3797_v50 }
  0xa1   :  { %3786 = vmatpush3.bf16.msra.mxu1 %v3785_v38  ;;  %3799 = vmatprep.subr.bf16.mxu0 %v4138_v0 }
  0xa4   :  { %3801 = vmatpush3.bf16.msra.mxu0 %v3800_v53 }
  0xa5   :  { %3802 = vmatprep.subr.bf16.mxu0 %v4138_v0 }
  0xa8   :  { %3804 = vmatpush3.bf16.msra.mxu0 %v3803_v56 }
  0xa9   :  { %3805 = vmatprep.subr.bf16.mxu0 %v4138_v0 }
  0xac   :  { %3807 = vmatpush3.bf16.msra.mxu0 %v3806_v59 }
  0xad   :  { %3808 = vmatprep.subr.bf16.mxu0 %v4138_v0  ;;  %v3260_v0 = vld [vmem:[%s4545_s4] ss:$0 sm:$0xff] }
  0xb0   :  { %3810 = vmatpush3.bf16.msra.mxu0 %v3809_v4 }
 0x166   :  { %v224_v61 = vpop.f32.mrb[0].mxu0 }
 0x167   :  { %v225_v62 = vadd.f32 %v3258_v60, %v224_v61  ;;  %v3680_v63 = vpop.f32.mrb[1].mxu0 }
 0x169   :  { %v228_v1 = vmax.f32 %v225_v62, 0.0 }
 0x16b   :  { %3714 = vmatmul.mubr.f32.vlgmr.msra.gmra.mrb[0].mxu1 %v228_v1 }
 0x16c   :  { %823 = vmatprep.mubr.bf16.mxu1 %v4142_v10 }
 0x23e   :  { %v318_v5 = vpop.f32.mrb[0].mxu1 }
 0x23f   :  { %v319_v6 = vadd.f32 %v3260_v0, %v318_v5  ;;  %v3715_v7 = vpop.f32.mrb[1].mxu1 }
 0x241   :  { %v322_v8 = vmax.f32 %v319_v6, 0.0 }
 0x243   :  { %3749 = vmatmul.mubr.f32.vlgmr.msra.gmra.mrb[2].mxu0 %v322_v8 }
 0x244   :  { %999 = vmatprep.mubr.bf16.mxu0 %v4142_v10 }
 0x316   :  { %v412_v12 = vpop.f32.mrb[2].mxu0 }
 0x317   :  { %v413_v13 = vadd.f32 %v3261_v11, %v412_v12  ;;  %v3750_v14 = vpop.f32.mrb[3].mxu0 }
 0x319   :  { %v4445_v15 = vmul.f32 0.5, %v413_v13 }
 0x31b   :  { %v420_v16 = vand.u32 2139095040, %v4445_v15  ;;  %v417_v20 = vand.u32 2147483647, %v4445_v15  ;;  %vm419_vm9 = vcmp.lt.s32.totalorder %v4445_v15, 0  ;;  %vm509_vm1 = vweird.f32 %v4445_v15 }
 0x31d   :  { %v421_v17 = vshrl.u32 %v420_v16, 23  ;;  %v424_v23 = vand.u32 8388607, %v417_v20  ;;  %vm418_vm10 = vcmp.le.f32.partialorder %v417_v20, 0.7853982 }
 0x31f   :  { %v3262_v18 = vadd.s32 4294967169, %v421_v17  ;;  %v425_v42 = vor.u32 8388608, %v424_v23 }
 0x321   :  { %v427_v19 = vadd.s32 1, %v3262_v18  ;;  %v465_v56 = vshll.u32 %v425_v42, 8 }
 0x323   :  { %vm428_vm2 = vcmp.gt.s32.totalorder %v427_v19, 0 }
 0x324   :  { %v429_v21 = vsel %vm428_vm2, %v427_v19, 0  ;;  %vm787_vm2 = vcmask 130048  }
 0x325   :  { %v431_v22 = vand.u32 31, %v429_v21  ;;  %v430_v25 = vshrl.u32 %v429_v21, 5 }
 0x327   :  { %v432_v24 = vsub.s32 32, %v431_v22  ;;  %v434_v27 = vshll.u32 %v4143_v26, %v431_v22  ;;  %v437_v29 = vshll.u32 %v4144_v28, %v431_v22  ;;  %v440_v33 = vshll.u32 %v4145_v31, %v431_v22 }
 0x328   :  { %v443_v36 = vshll.u32 %v4146_v34, %v431_v22  ;;  %v446_v39 = vshll.u32 %v4147_v37, %v431_v22  ;;  %vm449_vm3 = vcmp.lt.s32.totalorder %v430_v25, 1  ;;  %vm452_vm4 = vcmp.lt.s32.totalorder %v430_v25, 4 }
 0x329   :  { %v435_v30 = vshrl.u32 %v4144_v28, %v432_v24  ;;  %v438_v32 = vshrl.u32 %v4145_v31, %v432_v24  ;;  %v441_v35 = vshrl.u32 %v4146_v34, %v432_v24  ;;  %v444_v38 = vshrl.u32 %v4147_v37, %v432_v24 }
 0x32a   :  { %v447_v41 = vshrl.u32 %v4148_v40, %v432_v24  ;;  %v433_v51 = vshrl.u32 %v4143_v26, %v432_v24  ;;  %vm451_vm5 = vcmp.lt.s32.totalorder %v430_v25, 3  ;;  %vm450_vm6 = vcmp.lt.s32.totalorder %v430_v25, 2 }
 0x32b   :  { %v436_v43 = vor.u32 %v435_v30, %v434_v27  ;;  %v439_v44 = vor.u32 %v438_v32, %v437_v29  ;;  %v442_v45 = vor.u32 %v441_v35, %v440_v33  ;;  %v445_v46 = vor.u32 %v444_v38, %v443_v36 }
 0x32c   :  { %v448_v47 = vor.u32 %v447_v41, %v446_v39 }
 0x32d   :  { %v454_v48 = vsel %vm452_vm4, %v442_v45, 2102212464  ;;  %v457_v49 = vsel %vm449_vm3, %v436_v43, %v439_v44  ;;  %v461_v50 = vsel %vm449_vm3, %v439_v44, %v442_v45  ;;  %v458_v52 = vsel %vm452_vm4, %v445_v46, 920167782 }
 0x32e   :  { %v462_v53 = vsel %vm452_vm4, %v448_v47, 1326507024  ;;  %v459_v54 = vsel %vm451_vm5, %v442_v45, %v458_v52  ;;  %v453_v57 = vsel %vm449_vm3, %v433_v51, %v436_v43  ;;  %v455_v58 = vsel %vm451_vm5, %v439_v44, %v454_v48 }
 0x32f   :  { %v463_v55 = vsel %vm451_vm5, %v445_v46, %v462_v53  ;;  %v460_v59 = vsel %vm450_vm6, %v457_v49, %v459_v54  ;;  %v456_v2 = vsel %vm450_vm6, %v453_v57, %v455_v58  ;;  %v4149_v52 = vmov 5   ;;  %v3885_v58 = vld [vmem:[%s4550_s9 + $0x4] ss:$16 sps:$4 sm:$0xff]  }
 0x330   :  { %v464_v60 = vsel %vm450_vm6, %v461_v50, %v463_v55  ;;  %v4454_v63 = vmul.u32.u64.low %v465_v56, %v460_v59  ;;  %v4455_v1 = vmul.u32.u64.high %v465_v56, %v460_v59, %v4454_v63  ;;  %v472_v4 = vmul.u32 %v465_v56, %v456_v2  ;;  %v3883_v59 = vld [vmem:[%s4550_s9] ss:$16 sps:$4 sm:$0xff]   ;;  %791 = vmatprep.subr.bf16.mxu1 %v3885_v58  ;;  %v4479_v2 = vld [vmem:[#allocation11 + $0x28] sm:$0xff] }
 0x331   :  { %v4451_v61 = vmul.u32.u64.low %v465_v56, %v464_v60  ;;  %v4452_v62 = vmul.u32.u64.high %v465_v56, %v464_v60, %v4451_v61  ;;  %v4150_v53 = vmov 1   ;;  %v4151_v54 = vmov 3   ;;  %792 = vmatpush1.bf16.msra.mxu1 %v3883_v59  ;;  %v3894_v60 = vld [vmem:[#allocation10 + $0xc] ss:$16 sps:$4 sm:$0xff]  }
 0x332   :  { %v475_v3 = vadd.s32 1, %v4455_v1  ;;  %v4153_v55 = vmov 6   ;;  %v4154_v56 = vmov 7   ;;  %v4155_v57 = vmov 8   ;;  %v3892_v61 = vld [vmem:[#allocation10 + $0x8] ss:$16 sps:$4 sm:$0xff]   ;;  %967 = vmatprep.subr.bf16.mxu0 %v3894_v60 }
 0x333   :  { %vm474_vm7 = vc.u32 %v4452_v62, %v4454_v63  ;;  %v473_v18 = vadd.s32 %v4454_v63, %v4452_v62  ;;  %968 = vmatpush1.bf16.msra.mxu0 %v3892_v61  ;;  %v3900_v62 = vld [vmem:[#allocation10 + $0x2c] ss:$16 sps:$4 sm:$0xff]   ;;  %v3898_v63 = vld [vmem:[#allocation10 + $0x28] ss:$16 sps:$4 sm:$0xff]   ;;  %v1020_v60 = vld [vmem:[#allocation11 + $0x20] sm:$0xff]  ;;  %vm922_vm3 = vcmask 261120  }
 0x334   :  { %v476_v0 = vsel %vm474_vm7, %v475_v3, %v4455_v1  ;;  %969 = vmatprep.subr.bf16.mxu0 %v3900_v62  ;;  %v4477_v1 = vld [vmem:[#allocation11 + $0x8] sm:$0xff] }
 0x335   :  { %v477_v5 = vadd.s32 %v476_v0, %v472_v4  ;;  %v3288_v3 = vcombine.low %v4477_v1, %v4479_v2  ;;  %v3289_v4 = vcombine.high %v4477_v1, %v4479_v2  ;;  %v1048_v1 = vld [vmem:[#allocation11 + $0x100] sm:$0xff] }
 0x336   :  { %v1052_v2 = vld [vmem:[#allocation11 + $0x120] sm:$0xff] }
 0x337   :  { %v478_v6 = vadd.s32 536870912, %v477_v5  ;;  %970 = vmatpush1.bf16.msra.mxu0 %v3898_v63 }
 0x338   :  { %2634 = vmatprep.subr.bf16.mxu0 %v3289_v4 }
 0x339   :  { %v479_v7 = vshrl.u32 %v478_v6, 30 }
 0x33b   :  { %v480_v8 = vshll.u32 %v479_v7, 30  ;;  %v503_v31 = vsub.s32 4, %v479_v7 }
 0x33d   :  { %v481_v11 = vsub.s32 %v477_v5, %v480_v8  ;;  %v504_v34 = vsel %vm419_vm9, %v503_v31, %v479_v7  ;;  %v632_v8 = vlaneseq }
 0x33e   :  { %v506_v36 = vsel %vm418_vm10, 0, %v504_v34 }
 0x33f   :  { %v483_v12 = vsub.s32 0, %v481_v11  ;;  %v613_v37 = vadd.s32 3, %v506_v36  ;;  %v510_v38 = vand.u32 3, %v506_v36 }
 0x341   :  { %v3263_v13 = vmin.u32 %v483_v12, %v481_v11  ;;  %v614_v39 = vand.u32 3, %v613_v37  ;;  %vm515_vm11 = vcmp.eq.s32.totalorder %v510_v38, 2  ;;  %vm512_vm13 = vcmp.eq.s32.totalorder %v510_v38, 0 }
 0x342   :  { %vm511_vm15 = vcmp.lt.s32.totalorder %v510_v38, 2  ;;  %v633_v12 = vshrl.u32 %v632_v8, 7 }
 0x343   :  { %v485_v14 = vclz %v3263_v13  ;;  %vm619_vm12 = vcmp.eq.s32.totalorder %v614_v39, 2  ;;  %vm616_vm14 = vcmp.eq.s32.totalorder %v614_v39, 0  ;;  %vm615_vm0 = vcmp.lt.s32.totalorder %v614_v39, 2 }
 0x345   :  { %v3264_v16 = vadd.s32 4294967294, %v485_v14 }
 0x347   :  { %vm3265_vm8 = vcmp.lt.s32.totalorder %v3264_v16, 0 }
 0x348   :  { %v488_v17 = vsel %vm3265_vm8, 0, %v3264_v16  ;;  %v649_v16 = vsub.s32 1, %v633_v12 }
 0x349   :  { %v489_v19 = vsub.s32 32, %v488_v17  ;;  %v493_v21 = vsub.s32 4294967266, %v488_v17  ;;  %v490_v22 = vshll.u32 %v481_v11, %v488_v17  ;;  %v634_v17 = vsub.s32 0, %v633_v12 }
 0x34b   :  { %v491_v23 = vshrl.u32 %v473_v18, %v489_v19  ;;  %v494_v24 = vadd.s32 127, %v493_v21  ;;  %v625_v18 = vld [vmem:[#allocation8] sm:$0xf]  ;;  %v664_v19 = vsub.s32 2, %v633_v12 }
 0x34c   :  { %v650_v21 = vrot.slane %v625_v18, %v649_v16 }
 0x34d   :  { %v492_v25 = vor.u32 %v491_v23, %v490_v22  ;;  %v495_v26 = vshll.u32 %v494_v24, 23  ;;  %v635_v24 = vrot.slane %v625_v18, %v634_v17 }
 0x34f   :  { %v496_v27 = vor.u32 4788187, %v495_v26  ;;  %v499_v29 = vcvt.s32.f32 %v492_v25  ;;  %v665_v25 = vrot.slane %v625_v18, %v664_v19 }
 0x351   :  { %v497_v28 = vand.u32 2147483647, %v496_v27 }
 0x353   :  { %v500_v30 = vmul.f32 %v499_v29, %v497_v28  ;;  %v679_v29 = vsub.s32 3, %v633_v12 }
 0x355   :  { %v501_v32 = vxor.u32 2147483648, %v500_v30 }
 0x357   :  { %v502_v33 = vsel %vm419_vm9, %v501_v32, %v500_v30  ;;  %v680_v32 = vrot.slane %v625_v18, %v679_v29  ;;  %v1025_v18 = vld [vmem:[#allocation11 + $0x48] sm:$0xff] }
 0x358   :  { %v505_v35 = vsel %vm418_vm10, %v4445_v15, %v502_v33  ;;  %v4152_v15 = vmov 4  }
 0x359   :  { %3933 = vcosq.f32 %v505_v35 }
 0x35a   :  { %3935 = vsinq.f32 %v505_v35 }
 0x363   :  { %v3934_v40 = vpop.eup %3933 }
 0x364   :  { %v3936_v41 = vpop.eup %3935  ;;  %v516_v42 = vxor.u32 2147483648, %v3934_v40 }
 0x365   :  { %v513_v43 = vxor.u32 2147483648, %v3936_v41 }
 0x366   :  { %v517_v44 = vsel %vm515_vm11, %v516_v42, %v3936_v41  ;;  %v621_v20 = vsel %vm619_vm12, %v516_v42, %v3936_v41 }
 0x367   :  { %v514_v45 = vsel %vm512_vm13, %v3934_v40, %v513_v43  ;;  %v618_v46 = vsel %vm616_vm14, %v3934_v40, %v513_v43  ;;  %v626_v40 = vld [vmem:[%s4549_s8] sm:$0x1f]  ;;  %v3886_v43 = vld [vmem:[%s4550_s9 + $0x8] ss:$16 sps:$4 sm:$0xff]  }
 0x368   :  { %v518_v47 = vsel %vm511_vm15, %v514_v45, %v517_v44  ;;  %v622_v48 = vsel %vm615_vm0, %v618_v46, %v621_v20  ;;  %v709_v20 = vrot.slane %v626_v40, %v649_v16  ;;  %v3891_v45 = vld [vmem:[#allocation10 + $0x4] ss:$16 sps:$4 sm:$0xff]   ;;  %v695_v46 = vrot.slane %v626_v40, %v634_v17 }
 0x369   :  { %v519_v49 = vsel %vm509_vm1, nan, %v518_v47  ;;  %v623_v50 = vsel %vm509_vm1, nan, %v622_v48  ;;  %v1024_v16 = vld [vmem:[#allocation11 + $0x40] sm:$0xff] }
 0x36a   :  { %v624_v51 = vsub.f32 %v623_v50, %v519_v49  ;;  %668 = vperm.xlu0 %3867, %v519_v49   ;;  %639 = vperm.xlu1 %3865, %v519_v49   ;;  %v1028_v17 = vld [vmem:[#allocation11 + $0x60] sm:$0xff] }
 0x36e   :  { %3870 = vset.pattern.permute.xlu0 %v4149_v52  ;;  %3866 = vset.pattern.permute.xlu1 %v4150_v53 }
 0x36f   :  { %712 = vperm.xlu0 %3870, %v519_v49   ;;  %653 = vperm.xlu1 %3866, %v519_v49  }
 0x373   :  { %3872 = vset.pattern.permute.xlu0 %v4142_v10  ;;  %3868 = vset.pattern.permute.xlu1 %v4151_v54 }
 0x374   :  { %683 = vperm.xlu1 %3868, %v519_v49   ;;  %629 = vperm.xlu0 %3872, %v624_v51  }
 0x378   :  { %3869 = vset.pattern.permute.xlu1 %v4152_v15  ;;  %3873 = vset.pattern.permute.xlu0 %v4150_v53  ;;  %v739_v53 = vrot.slane %v626_v40, %v679_v29  ;;  %v3294_v29 = vcombine.low %v1024_v16, %v1028_v17 }
 0x379   :  { %698 = vperm.xlu1 %3869, %v519_v49   ;;  %644 = vperm.xlu0 %3873, %v624_v51  }
 0x37d   :  { %3871 = vset.pattern.permute.xlu1 %v4153_v55  ;;  %3877 = vset.pattern.permute.xlu0 %v4152_v15  ;;  %v3889_v15 = vld [vmem:[#allocation10] ss:$16 sps:$4 sm:$0xff]  }
 0x37e   :  { %727 = vperm.xlu1 %3871, %v519_v49   ;;  %689 = vperm.xlu0 %3877, %v624_v51  }
 0x382   :  { %3874 = vset.pattern.permute.xlu1 %v4141_v9  ;;  %3880 = vset.pattern.permute.xlu0 %v4154_v56  ;;  %v3888_v9 = vld [vmem:[%s4550_s9 + $0xc] ss:$16 sps:$4 sm:$0xff]  }
 0x383   :  { %659 = vperm.xlu1 %3874, %v624_v51   ;;  %733 = vperm.xlu0 %3880, %v624_v51  }
 0x384   :  { %832 = vmatprep.subr.bf16.mxu1 %v3888_v9  ;;  %v1016_v9 = vld [vmem:[#allocation11] sm:$0xff] }
 0x387   :  { %3875 = vset.pattern.permute.xlu1 %v4151_v54  ;;  %3882 = vset.pattern.permute.xlu0 %v4155_v57 }
 0x388   :  { %674 = vperm.xlu1 %3875, %v624_v51   ;;  %757 = vperm.xlu0 %3882, %v519_v49  }
 0x38c   :  { %3876 = vset.pattern.permute.xlu1 %v4154_v56 }
 0x38d   :  { %742 = vperm.xlu1 %3876, %v519_v49  }
 0x391   :  { %3878 = vset.pattern.permute.xlu1 %v4149_v52  ;;  %v753_v52 = vsub.s32 4, %v633_v12 }
 0x392   :  { %703 = vperm.xlu1 %3878, %v624_v51  }
 0x393   :  { %v754_v61 = vrot.slane %v626_v40, %v753_v52 }
 0x396   :  { %3879 = vset.pattern.permute.xlu1 %v4153_v55 }
 0x397   :  { %718 = vperm.xlu1 %3879, %v624_v51  }
 0x39b   :  { %3881 = vset.pattern.permute.xlu1 %v4155_v57  ;;  %v3897_v57 = vld [vmem:[#allocation10 + $0x24] ss:$16 sps:$4 sm:$0xff]  }
 0x39c   :  { %748 = vperm.xlu1 %3881, %v624_v51   ;;  %v724_v51 = vrot.slane %v626_v40, %v664_v19  ;;  %v1029_v19 = vld [vmem:[#allocation11 + $0x68] sm:$0xff] }
 0x3e9   :  { %v640_v0 = vpop.permute.xlu1 %639  ;;  %v669_v5 = vpop.permute.xlu0 %668 }
 0x3ee   :  { %v654_v6 = vpop.permute.xlu1 %653  ;;  %v713_v7 = vpop.permute.xlu0 %712 }
 0x3f3   :  { %v684_v11 = vpop.permute.xlu1 %683  ;;  %v630_v13 = vpop.permute.xlu0 %629 }
 0x3f4   :  { %v636_v27 = vmul.f32 %v635_v24, %v630_v13  ;;  %v3297_v24 = vcombine.high %v1025_v18, %v1029_v19 }
 0x3f6   :  { %v642_v33 = vadd.f32 %v640_v0, %v636_v27  ;;  %v3895_v0 = vld [vmem:[#allocation10 + $0x20] ss:$16 sps:$4 sm:$0xff]   ;;  %v1033_v27 = vld [vmem:[#allocation11 + $0x88] sm:$0xff] }
 0x3f8   :  { %v699_v14 = vpop.permute.xlu1 %698  ;;  %v645_v22 = vpop.permute.xlu0 %644 }
 0x3f9   :  { %v651_v26 = vmul.f32 %v650_v21, %v645_v22  ;;  %v3286_v22 = vcombine.low %v1016_v9, %v1020_v60 }
 0x3fb   :  { %v656_v31 = vadd.f32 %v654_v6, %v651_v26  ;;  %v1036_v26 = vld [vmem:[#allocation11 + $0xa0] sm:$0xff] }
 0x3fd   :  { %v728_v23 = vpop.permute.xlu1 %727  ;;  %v657_v36 = vmul.f32 %v656_v31, %v642_v33  ;;  %v690_v47 = vpop.permute.xlu0 %689  ;;  %v1040_v33 = vld [vmem:[#allocation11 + $0xc0] sm:$0xff] }
 0x3fe   :  { %v696_v50 = vmul.f32 %v695_v46, %v690_v47  ;;  %v1060_v46 = vld [vmem:[#allocation11 + $0x160] sm:$0xff]  ;;  %v1057_v47 = vld [vmem:[#allocation11 + $0x148] sm:$0xff] }
 0x400   :  { %v701_v58 = vadd.f32 %v699_v14, %v696_v50 }
 0x402   :  { %v660_v28 = vpop.permute.xlu1 %659  ;;  %v734_v55 = vpop.permute.xlu0 %733 }
 0x403   :  { %v666_v30 = vmul.f32 %v665_v25, %v660_v28  ;;  %v740_v62 = vmul.f32 %v739_v53, %v734_v55  ;;  %v1032_v25 = vld [vmem:[#allocation11 + $0x80] sm:$0xff]  ;;  %v1037_v28 = vld [vmem:[#allocation11 + $0xa8] sm:$0xff] }
 0x404   :  { %v3303_v31 = vcombine.high %v1032_v25, %v1036_v26  ;;  %v1064_v53 = vld [vmem:[#allocation11 + $0x180] sm:$0xff]  ;;  %v1069_v55 = vld [vmem:[#allocation11 + $0x1a8] sm:$0xff] }
 0x405   :  { %v671_v34 = vadd.f32 %v669_v5, %v666_v30  ;;  %v3287_v5 = vcombine.high %v1016_v9, %v1020_v60  ;;  %v3296_v30 = vcombine.low %v1025_v18, %v1029_v19  ;;  %v1072_v9 = vld [vmem:[#allocation11 + $0x1c0] sm:$0xff]  ;;  %v1089_v19 = vld [vmem:[#allocation11 + $0x248] sm:$0xff] }
 0x406   :  { %v1076_v60 = vld [vmem:[#allocation11 + $0x1e0] sm:$0xff] }
 0x407   :  { %v675_v35 = vpop.permute.xlu1 %674  ;;  %v672_v38 = vmul.f32 %v671_v34, %v657_v36  ;;  %v758_v12 = vpop.permute.xlu0 %757  ;;  %v1044_v34 = vld [vmem:[#allocation11 + $0xe0] sm:$0xff]  ;;  %v1045_v36 = vld [vmem:[#allocation11 + $0xe8] sm:$0xff] }
 0x408   :  { %v681_v37 = vmul.f32 %v680_v32, %v675_v35  ;;  %v3305_v32 = vcombine.high %v1033_v27, %v1037_v28  ;;  %v1041_v35 = vld [vmem:[#allocation11 + $0xc8] sm:$0xff]  ;;  %v1092_v18 = vld [vmem:[#allocation11 + $0x260] sm:$0xff] }
 0x409   :  { %v3313_v40 = vcombine.high %v1041_v35, %v1045_v36 }
 0x40a   :  { %v686_v39 = vadd.f32 %v684_v11, %v681_v37  ;;  %v3302_v37 = vcombine.low %v1032_v25, %v1036_v26 }
 0x40c   :  { %v687_v41 = vmul.f32 %v686_v39, %v672_v38  ;;  %v743_v42 = vpop.permute.xlu1 %742  ;;  %v3304_v38 = vcombine.low %v1033_v27, %v1037_v28  ;;  %v3311_v39 = vcombine.high %v1040_v33, %v1044_v34  ;;  %v1096_v27 = vld [vmem:[#allocation11 + $0x280] sm:$0xff] }
 0x40d   :  { %v745_v6 = vadd.f32 %v743_v42, %v740_v62  ;;  %v3310_v42 = vcombine.low %v1040_v33, %v1044_v34  ;;  %v1077_v62 = vld [vmem:[#allocation11 + $0x1e8] sm:$0xff]  ;;  %v1100_v28 = vld [vmem:[#allocation11 + $0x2a0] sm:$0xff] }
 0x40e   :  { %v762_v44 = vpack.c.bf16 %v687_v41, %v687_v41  ;;  %v1053_v41 = vld [vmem:[#allocation11 + $0x128] sm:$0xff] }
 0x410   :  { %3274 = vmatmul.mubr.msk.bf16.vlgmr.msra.gmra.mrb[4].mxu1 %vm787_vm2, %v762_v44 }
 0x411   :  { %v704_v48 = vpop.permute.xlu1 %703  ;;  %833 = vmatpush1.bf16.msra.mxu1 %v3886_v43  ;;  %864 = vmatprep.mubr.bf16.mxu1 %v4142_v10  ;;  %v3312_v43 = vcombine.low %v1041_v35, %v1045_v36  ;;  %v1104_v35 = vld [vmem:[#allocation11 + $0x2c0] sm:$0xff] }
 0x412   :  { %v710_v49 = vmul.f32 %v709_v20, %v704_v48  ;;  %926 = vmatprep.subr.bf16.mxu1 %v3891_v45  ;;  %v1056_v45 = vld [vmem:[#allocation11 + $0x140] sm:$0xff]  ;;  %v1061_v48 = vld [vmem:[#allocation11 + $0x168] sm:$0xff] }
 0x413   :  { %v3329_v52 = vcombine.high %v1057_v47, %v1061_v48  ;;  %v1108_v36 = vld [vmem:[#allocation11 + $0x2e0] sm:$0xff] }
 0x414   :  { %v715_v54 = vadd.f32 %v713_v7, %v710_v49  ;;  %v3318_v49 = vcombine.low %v1048_v1, %v1052_v2 }
 0x416   :  { %v719_v56 = vpop.permute.xlu1 %718  ;;  %v716_v63 = vmul.f32 %v715_v54, %v701_v58  ;;  %v1068_v54 = vld [vmem:[#allocation11 + $0x1a0] sm:$0xff] }
 0x417   :  { %v725_v59 = vmul.f32 %v724_v51, %v719_v56  ;;  %v3327_v51 = vcombine.high %v1056_v45, %v1060_v46  ;;  %v3326_v56 = vcombine.low %v1056_v45, %v1060_v46  ;;  %v3335_v58 = vcombine.high %v1064_v53, %v1068_v54 }
 0x418   :  { %3275 = vmatmul.mubr.msk.bf16.vlgmr.msra.gmra.mrb[8].mxu1 %vm787_vm2, %v762_v44  ;;  %v3319_v44 = vcombine.high %v1048_v1, %v1052_v2 }
 0x419   :  { %v730_v4 = vadd.f32 %v728_v23, %v725_v59  ;;  %927 = vmatpush1.bf16.msra.mxu1 %v3889_v15  ;;  %958 = vmatprep.mubr.bf16.mxu1 %v4142_v10  ;;  %v3295_v10 = vcombine.high %v1024_v16, %v1028_v17  ;;  %v1065_v15 = vld [vmem:[#allocation11 + $0x188] sm:$0xff]  ;;  %v1088_v17 = vld [vmem:[#allocation11 + $0x240] sm:$0xff] }
 0x41a   :  { %928 = vmatprep.subr.bf16.mxu1 %v3897_v57  ;;  %v3328_v57 = vcombine.low %v1057_v47, %v1061_v48  ;;  %v3337_v59 = vcombine.high %v1065_v15, %v1069_v55  ;;  %v3358_v25 = vcombine.low %v1088_v17, %v1092_v18  ;;  %v1120_v47 = vld [vmem:[#allocation11 + $0x340] sm:$0xff] }
 0x41b   :  { %v731_v7 = vmul.f32 %v730_v4, %v716_v63  ;;  %v749_v8 = vpop.permute.xlu1 %748  ;;  %v3334_v63 = vcombine.low %v1064_v53, %v1068_v54  ;;  %v3336_v4 = vcombine.low %v1065_v15, %v1069_v55  ;;  %v1124_v48 = vld [vmem:[#allocation11 + $0x360] sm:$0xff] }
 0x41c   :  { %v755_v11 = vmul.f32 %v754_v61, %v749_v8  ;;  %v1073_v61 = vld [vmem:[#allocation11 + $0x1c8] sm:$0xff]  ;;  %v1128_v53 = vld [vmem:[#allocation11 + $0x380] sm:$0xff] }
 0x41d   :  { %v746_v13 = vmul.f32 %v745_v6, %v731_v7  ;;  %929 = vmatpush1.bf16.msra.mxu1 %v3895_v0  ;;  %v3343_v0 = vcombine.high %v1072_v9, %v1076_v60  ;;  %v1080_v6 = vld [vmem:[#allocation11 + $0x200] sm:$0xff]  ;;  %v1081_v8 = vld [vmem:[#allocation11 + $0x208] sm:$0xff] }
 0x41e   :  { %v760_v14 = vadd.f32 %v758_v12, %v755_v11  ;;  %2552 = vmatprep.subr.bf16.mxu1 %v3287_v5  ;;  %v3345_v5 = vcombine.high %v1073_v61, %v1077_v62  ;;  %v1084_v7 = vld [vmem:[#allocation11 + $0x220] sm:$0xff]  ;;  %v1085_v11 = vld [vmem:[#allocation11 + $0x228] sm:$0xff]  ;;  %v3342_v12 = vcombine.low %v1072_v9, %v1076_v60 }
 0x41f   :  { %v3353_v16 = vcombine.high %v1081_v8, %v1085_v11  ;;  %v1132_v54 = vld [vmem:[#allocation11 + $0x3a0] sm:$0xff] }
 0x420   :  { %v761_v21 = vmul.f32 %v760_v14, %v746_v13  ;;  %v3344_v13 = vcombine.low %v1073_v61, %v1077_v62  ;;  %v3351_v14 = vcombine.high %v1080_v6, %v1084_v7  ;;  %v3398_v9 = vcombine.low %v1128_v53, %v1132_v54  ;;  %v1136_v61 = vld [vmem:[#allocation11 + $0x3c0] sm:$0xff] }
 0x421   :  { %v1140_v62 = vld [vmem:[#allocation11 + $0x3e0] sm:$0xff] }
 0x422   :  { %v873_v23 = vpack.c.bf16 %v761_v21, %v761_v21  ;;  %v1093_v21 = vld [vmem:[#allocation11 + $0x268] sm:$0xff] }
 0x423   :  { %v3360_v26 = vcombine.low %v1089_v19, %v1093_v21 }
 0x424   :  { %3284 = vmatmul.mubr.msk.bf16.vlgmr.msra.gmra.mrb[12].mxu1 %vm922_vm3, %v873_v23  ;;  %3285 = vmatmul.mubr.msk.bf16.vlgmr.msra.gmra.mrb[4].mxu0 %vm922_vm3, %v873_v23  ;;  %v3352_v23 = vcombine.low %v1081_v8, %v1085_v11  ;;  %v1144_v8 = vld [vmem:[#allocation11 + $0x400] sm:$0xff] }
 0x425   :  { %2553 = vmatpush1.bf16.msra.mxu1 %v3286_v22  ;;  %2635 = vmatpush1.bf16.msra.mxu0 %v3288_v3  ;;  %v1049_v3 = vld [vmem:[#allocation11 + $0x108] sm:$0xff]  ;;  %v3350_v22 = vcombine.low %v1080_v6, %v1084_v7  ;;  %v1148_v11 = vld [vmem:[#allocation11 + $0x420] sm:$0xff] }
 0x426   :  { %2554 = vmatprep.subr.bf16.mxu1 %v3295_v10  ;;  %2636 = vmatprep.subr.bf16.mxu0 %v3297_v24  ;;  %v3321_v20 = vcombine.high %v1049_v3, %v1053_v41  ;;  %v3320_v50 = vcombine.low %v1049_v3, %v1053_v41  ;;  %v3359_v10 = vcombine.high %v1088_v17, %v1092_v18  ;;  %v1112_v3 = vld [vmem:[#allocation11 + $0x300] sm:$0xff] }
 0x427   :  { %v3361_v24 = vcombine.high %v1089_v19, %v1093_v21  ;;  %v1116_v41 = vld [vmem:[#allocation11 + $0x320] sm:$0xff] }
 0x429   :  { %2555 = vmatpush1.bf16.msra.mxu1 %v3294_v29  ;;  %2637 = vmatpush1.bf16.msra.mxu0 %v3296_v30  ;;  %v1097_v29 = vld [vmem:[#allocation11 + $0x288] sm:$0xff]  ;;  %v3367_v30 = vcombine.high %v1096_v27, %v1100_v28 }
 0x42a   :  { %2556 = vmatprep.subr.bf16.mxu1 %v3303_v31  ;;  %2638 = vmatprep.subr.bf16.mxu0 %v3305_v32  ;;  %v1101_v31 = vld [vmem:[#allocation11 + $0x2a8] sm:$0xff]  ;;  %v3366_v32 = vcombine.low %v1096_v27, %v1100_v28 }
 0x42b   :  { %v3368_v33 = vcombine.low %v1097_v29, %v1101_v31  ;;  %v3369_v34 = vcombine.high %v1097_v29, %v1101_v31 }
 0x42d   :  { %2557 = vmatpush1.bf16.msra.mxu1 %v3302_v37  ;;  %2639 = vmatpush1.bf16.msra.mxu0 %v3304_v38  ;;  %v1105_v37 = vld [vmem:[#allocation11 + $0x2c8] sm:$0xff]  ;;  %v3374_v38 = vcombine.low %v1104_v35, %v1108_v36 }
 0x42e   :  { %2558 = vmatprep.subr.bf16.mxu1 %v3311_v39  ;;  %2640 = vmatprep.subr.bf16.mxu0 %v3313_v40  ;;  %v3375_v39 = vcombine.high %v1104_v35, %v1108_v36  ;;  %v1109_v40 = vld [vmem:[#allocation11 + $0x2e8] sm:$0xff] }
 0x42f   :  { %v3376_v1 = vcombine.low %v1105_v37, %v1109_v40  ;;  %v3377_v2 = vcombine.high %v1105_v37, %v1109_v40  ;;  %v1152_v37 = vld [vmem:[#allocation11 + $0x440] sm:$0xff] }
 0x430   :  { %v1156_v40 = vld [vmem:[#allocation11 + $0x460] sm:$0xff] }
 0x431   :  { %2559 = vmatpush1.bf16.msra.mxu1 %v3310_v42  ;;  %2641 = vmatpush1.bf16.msra.mxu0 %v3312_v43  ;;  %v1113_v42 = vld [vmem:[#allocation11 + $0x308] sm:$0xff]  ;;  %v3383_v43 = vcombine.high %v1112_v3, %v1116_v41 }
 0x432   :  { %2560 = vmatprep.subr.bf16.mxu1 %v3319_v44  ;;  %2642 = vmatprep.subr.bf16.mxu0 %v3321_v20  ;;  %v1117_v44 = vld [vmem:[#allocation11 + $0x328] sm:$0xff]  ;;  %v3382_v20 = vcombine.low %v1112_v3, %v1116_v41 }
 0x433   :  { %v3384_v45 = vcombine.low %v1113_v42, %v1117_v44  ;;  %v3385_v46 = vcombine.high %v1113_v42, %v1117_v44  ;;  %v1160_v42 = vld [vmem:[#allocation11 + $0x480] sm:$0xff] }
 0x435   :  { %2561 = vmatpush1.bf16.msra.mxu1 %v3318_v49  ;;  %2643 = vmatpush1.bf16.msra.mxu0 %v3320_v50  ;;  %v1121_v49 = vld [vmem:[#allocation11 + $0x348] sm:$0xff]  ;;  %v3390_v50 = vcombine.low %v1120_v47, %v1124_v48 }
 0x436   :  { %2562 = vmatprep.subr.bf16.mxu1 %v3327_v51  ;;  %2644 = vmatprep.subr.bf16.mxu0 %v3329_v52  ;;  %v3391_v51 = vcombine.high %v1120_v47, %v1124_v48  ;;  %v1125_v52 = vld [vmem:[#allocation11 + $0x368] sm:$0xff]  ;;  %v3422_v48 = vcombine.low %v1152_v37, %v1156_v40 }
 0x437   :  { %v3392_v15 = vcombine.low %v1121_v49, %v1125_v52  ;;  %v3393_v55 = vcombine.high %v1121_v49, %v1125_v52  ;;  %v1168_v52 = vld [vmem:[#allocation11 + $0x4c0] sm:$0xff] }
 0x439   :  { %2563 = vmatpush1.bf16.msra.mxu1 %v3326_v56  ;;  %2645 = vmatpush1.bf16.msra.mxu0 %v3328_v57  ;;  %v3399_v56 = vcombine.high %v1128_v53, %v1132_v54  ;;  %v1129_v57 = vld [vmem:[#allocation11 + $0x388] sm:$0xff]  ;;  %v1172_v53 = vld [vmem:[#allocation11 + $0x4e0] sm:$0xff] }
 0x43a   :  { %2564 = vmatprep.subr.bf16.mxu1 %v3335_v58  ;;  %2646 = vmatprep.subr.bf16.mxu0 %v3337_v59  ;;  %v1133_v58 = vld [vmem:[#allocation11 + $0x3a8] sm:$0xff] }
 0x43b   :  { %v3401_v59 = vcombine.high %v1129_v57, %v1133_v58  ;;  %v3400_v60 = vcombine.low %v1129_v57, %v1133_v58  ;;  %v1169_v54 = vld [vmem:[#allocation11 + $0x4c8] sm:$0xff]  ;;  %v3439_v57 = vcombine.high %v1168_v52, %v1172_v53 }
 0x43d   :  { %2565 = vmatpush1.bf16.msra.mxu1 %v3334_v63  ;;  %2647 = vmatpush1.bf16.msra.mxu0 %v3336_v4  ;;  %v1137_v63 = vld [vmem:[#allocation11 + $0x3c8] sm:$0xff]  ;;  %v3407_v4 = vcombine.high %v1136_v61, %v1140_v62 }
 0x43e   :  { %2566 = vmatprep.subr.bf16.mxu1 %v3343_v0  ;;  %2648 = vmatprep.subr.bf16.mxu0 %v3345_v5  ;;  %v1141_v0 = vld [vmem:[#allocation11 + $0x3e8] sm:$0xff]  ;;  %v3406_v5 = vcombine.low %v1136_v61, %v1140_v62  ;;  %v3438_v62 = vcombine.low %v1168_v52, %v1172_v53 }
 0x43f   :  { %v3408_v6 = vcombine.low %v1137_v63, %v1141_v0  ;;  %v3409_v7 = vcombine.high %v1137_v63, %v1141_v0  ;;  %v1181_v61 = vld [vmem:[#allocation11 + $0x528] sm:$0xff] }
 0x441   :  { %2567 = vmatpush1.bf16.msra.mxu1 %v3342_v12  ;;  %2649 = vmatpush1.bf16.msra.mxu0 %v3344_v13  ;;  %v1145_v12 = vld [vmem:[#allocation11 + $0x408] sm:$0xff]  ;;  %v3415_v13 = vcombine.high %v1144_v8, %v1148_v11 }
 0x442   :  { %2568 = vmatprep.subr.bf16.mxu1 %v3351_v14  ;;  %2650 = vmatprep.subr.bf16.mxu0 %v3353_v16  ;;  %v1149_v14 = vld [vmem:[#allocation11 + $0x428] sm:$0xff]  ;;  %v3414_v16 = vcombine.low %v1144_v8, %v1148_v11 }
 0x443   :  { %v3416_v17 = vcombine.low %v1145_v12, %v1149_v14  ;;  %v3417_v18 = vcombine.high %v1145_v12, %v1149_v14  ;;  %v1189_v8 = vld [vmem:[#allocation11 + $0x568] sm:$0xff] }
 0x445   :  { %2569 = vmatpush1.bf16.msra.mxu1 %v3350_v22  ;;  %2651 = vmatpush1.bf16.msra.mxu0 %v3352_v23 }
 0x446   :  { %2570 = vmatprep.subr.bf16.mxu1 %v3359_v10  ;;  %2652 = vmatprep.subr.bf16.mxu0 %v3361_v24 }
 0x449   :  { %2571 = vmatpush1.bf16.msra.mxu1 %v3358_v25  ;;  %2653 = vmatpush1.bf16.msra.mxu0 %v3360_v26 }
 0x44a   :  { %2572 = vmatprep.subr.bf16.mxu1 %v3367_v30  ;;  %2654 = vmatprep.subr.bf16.mxu0 %v3369_v34 }
 0x44d   :  { %2573 = vmatpush1.bf16.msra.mxu1 %v3366_v32  ;;  %2655 = vmatpush1.bf16.msra.mxu0 %v3368_v33 }
 0x44e   :  { %2574 = vmatprep.subr.bf16.mxu1 %v3375_v39  ;;  %2656 = vmatprep.subr.bf16.mxu0 %v3377_v2  ;;  %v1157_v2 = vld [vmem:[#allocation11 + $0x468] sm:$0xff] }
 0x451   :  { %2575 = vmatpush1.bf16.msra.mxu1 %v3374_v38  ;;  %2657 = vmatpush1.bf16.msra.mxu0 %v3376_v1  ;;  %v1153_v1 = vld [vmem:[#allocation11 + $0x448] sm:$0xff] }
 0x452   :  { %2576 = vmatprep.subr.bf16.mxu1 %v3383_v43  ;;  %2658 = vmatprep.subr.bf16.mxu0 %v3385_v46  ;;  %v3423_v43 = vcombine.high %v1152_v37, %v1156_v40  ;;  %v3425_v44 = vcombine.high %v1153_v1, %v1157_v2  ;;  %v1165_v46 = vld [vmem:[#allocation11 + $0x4a8] sm:$0xff]  ;;  %v3424_v49 = vcombine.low %v1153_v1, %v1157_v2  ;;  %v1216_v1 = vld [vmem:[#allocation11 + $0x640] sm:$0xff] }
 0x453   :  { %v1220_v2 = vld [vmem:[#allocation11 + $0x660] sm:$0xff] }
 0x454   :  { %v3486_v52 = vcombine.low %v1216_v1, %v1220_v2 }
 0x455   :  { %2577 = vmatpush1.bf16.msra.mxu1 %v3382_v20  ;;  %2659 = vmatpush1.bf16.msra.mxu0 %v3384_v45  ;;  %v1164_v20 = vld [vmem:[#allocation11 + $0x4a0] sm:$0xff]  ;;  %v1161_v45 = vld [vmem:[#allocation11 + $0x488] sm:$0xff] }
 0x456   :  { %2578 = vmatprep.subr.bf16.mxu1 %v3391_v51  ;;  %2660 = vmatprep.subr.bf16.mxu0 %v3393_v55  ;;  %v3433_v51 = vcombine.high %v1161_v45, %v1165_v46  ;;  %v3430_v55 = vcombine.low %v1160_v42, %v1164_v20 }
 0x459   :  { %2579 = vmatpush1.bf16.msra.mxu1 %v3390_v50  ;;  %2661 = vmatpush1.bf16.msra.mxu0 %v3392_v15  ;;  %v3431_v50 = vcombine.high %v1160_v42, %v1164_v20  ;;  %v1173_v15 = vld [vmem:[#allocation11 + $0x4e8] sm:$0xff] }
 0x45a   :  { %2580 = vmatprep.subr.bf16.mxu1 %v3399_v56  ;;  %2662 = vmatprep.subr.bf16.mxu0 %v3401_v59  ;;  %v3432_v56 = vcombine.low %v1161_v45, %v1165_v46  ;;  %v3441_v58 = vcombine.high %v1169_v54, %v1173_v15  ;;  %v1176_v59 = vld [vmem:[#allocation11 + $0x500] sm:$0xff]  ;;  %v3440_v63 = vcombine.low %v1169_v54, %v1173_v15  ;;  %v1217_v42 = vld [vmem:[#allocation11 + $0x648] sm:$0xff] }
 0x45b   :  { %v3487_v45 = vcombine.high %v1216_v1, %v1220_v2 }
 0x45d   :  { %2581 = vmatpush1.bf16.msra.mxu1 %v3398_v9  ;;  %2663 = vmatpush1.bf16.msra.mxu0 %v3400_v60  ;;  %v1180_v9 = vld [vmem:[#allocation11 + $0x520] sm:$0xff]  ;;  %v1177_v60 = vld [vmem:[#allocation11 + $0x508] sm:$0xff] }
 0x45e   :  { %2582 = vmatprep.subr.bf16.mxu1 %v3407_v4  ;;  %2664 = vmatprep.subr.bf16.mxu0 %v3409_v7  ;;  %v3447_v4 = vcombine.high %v1176_v59, %v1180_v9  ;;  %v3449_v0 = vcombine.high %v1177_v60, %v1181_v61  ;;  %v1185_v7 = vld [vmem:[#allocation11 + $0x548] sm:$0xff]  ;;  %v3446_v11 = vcombine.low %v1176_v59, %v1180_v9 }
 0x45f   :  { %v3448_v12 = vcombine.low %v1177_v60, %v1181_v61  ;;  %v3457_v14 = vcombine.high %v1185_v7, %v1189_v8 }
 0x461   :  { %2583 = vmatpush1.bf16.msra.mxu1 %v3406_v5  ;;  %2665 = vmatpush1.bf16.msra.mxu0 %v3408_v6  ;;  %v1184_v5 = vld [vmem:[#allocation11 + $0x540] sm:$0xff] }
 0x462   :  { %2593 = vmatprep.subr.bf16.mxu1 %v3415_v13  ;;  %2675 = vmatprep.subr.bf16.mxu0 %v3417_v18  ;;  %v1188_v6 = vld [vmem:[#allocation11 + $0x560] sm:$0xff]  ;;  %v1193_v18 = vld [vmem:[#allocation11 + $0x588] sm:$0xff] }
 0x463   :  { %v3455_v13 = vcombine.high %v1184_v5, %v1188_v6 }
 0x4e3   :  { %v825_v19 = vpop.f32.mrb[4].mxu1 }
 0x4e4   :  { %v827_v21 = vpop.f32.mrb[5].mxu1 }
 0x4e5   :  { %v829_v22 = vpop.f32.mrb[6].mxu1 }
 0x4e6   :  { %v830_v23 = vpop.f32.mrb[7].mxu1  ;;  %v3456_v22 = vcombine.low %v1185_v7, %v1189_v8 }
 0x4eb   :  { %v866_v10 = vpop.f32.mrb[8].mxu1 }
 0x4ec   :  { %v868_v24 = vpop.f32.mrb[9].mxu1 }
 0x4ed   :  { %v870_v25 = vpop.f32.mrb[10].mxu1 }
 0x4ee   :  { %v871_v26 = vpop.f32.mrb[11].mxu1  ;;  %v1204_v25 = vld [vmem:[#allocation11 + $0x5e0] sm:$0xff] }
 0x4ef   :  { %v1201_v26 = vld [vmem:[#allocation11 + $0x5c8] sm:$0xff] }
 0x4f7   :  { %v960_v27 = vpop.f32.mrb[12].mxu1  ;;  %v1001_v28 = vpop.f32.mrb[4].mxu0 }
 0x4f8   :  { %v1008_v29 = vmul.f32 %v960_v27, %v825_v19  ;;  %v4498_v30 = vmul.f32 %v1001_v28, %v866_v10  ;;  %v962_v31 = vpop.f32.mrb[13].mxu1  ;;  %v1003_v32 = vpop.f32.mrb[5].mxu0  ;;  %v1197_v19 = vld [vmem:[#allocation11 + $0x5a8] sm:$0xff] }
 0x4f9   :  { %v1009_v33 = vmul.f32 %v962_v31, %v827_v21  ;;  %v1011_v34 = vmul.f32 %v1003_v32, %v868_v24  ;;  %v964_v35 = vpop.f32.mrb[14].mxu1  ;;  %v1005_v36 = vpop.f32.mrb[6].mxu0  ;;  %v3454_v21 = vcombine.low %v1184_v5, %v1188_v6  ;;  %v3465_v10 = vcombine.high %v1193_v18, %v1197_v19  ;;  %v1200_v24 = vld [vmem:[#allocation11 + $0x5c0] sm:$0xff]  ;;  %v1205_v27 = vld [vmem:[#allocation11 + $0x5e8] sm:$0xff] }
 0x4fa   :  { %v965_v38 = vpop.f32.mrb[15].mxu1  ;;  %v1006_v39 = vpop.f32.mrb[7].mxu0  ;;  %v4502_v41 = vpack.c.bf16 %v1008_v29, %v1008_v29  ;;  %v3464_v29 = vcombine.low %v1193_v18, %v1197_v19  ;;  %v3471_v31 = vcombine.high %v1200_v24, %v1204_v25  ;;  %v3473_v32 = vcombine.high %v1201_v26, %v1205_v27  ;;  %v1209_v35 = vld [vmem:[#allocation11 + $0x608] sm:$0xff] }
 0x4fb   :  { %v4500_v3 = vpack.c.bf16 %v1009_v33, %v1009_v33  ;;  %v4506_v47 = vpack.c.bf16 %v1011_v34, %v1011_v34  ;;  %v1208_v33 = vld [vmem:[#allocation11 + $0x600] sm:$0xff]  ;;  %v1213_v36 = vld [vmem:[#allocation11 + $0x628] sm:$0xff]  ;;  %v3470_v37 = vcombine.low %v1200_v24, %v1204_v25  ;;  %v3472_v38 = vcombine.low %v1201_v26, %v1205_v27 }
 0x4fc   :  { %v1212_v34 = vld [vmem:[#allocation11 + $0x620] sm:$0xff]  ;;  %v3481_v40 = vcombine.high %v1209_v35, %v1213_v36  ;;  %v3480_v20 = vcombine.low %v1209_v35, %v1213_v36 }
 0x4fd   :  { %2584 = vmatprep.mubr.bf16.mxu1 %v4500_v3  ;;  %2666 = vmatprep.mubr.bf16.mxu0 %v4500_v3  ;;  %v3479_v39 = vcombine.high %v1208_v33, %v1212_v34 }
 0x4fe   :  { %2585 = vmatmul.mubr.bf16.vlgmr.msra.gmra.mrb[16].mxu1 %v4502_v41  ;;  %2667 = vmatmul.mubr.bf16.vlgmr.msra.gmra.mrb[8].mxu0 %v4502_v41 }
 0x4ff   :  { %2594 = vmatpush1.bf16.msra.mxu1 %v3414_v16  ;;  %2676 = vmatpush1.bf16.msra.mxu0 %v3416_v17  ;;  %v1192_v16 = vld [vmem:[#allocation11 + $0x580] sm:$0xff] }
 0x500   :  { %2625 = vmatprep.mubr.bf16.mxu1 %v4506_v47  ;;  %2707 = vmatprep.mubr.bf16.mxu0 %v4506_v47  ;;  %v1196_v17 = vld [vmem:[#allocation11 + $0x5a0] sm:$0xff] }
 0x501   :  { %2595 = vmatprep.subr.bf16.mxu1 %v3423_v43  ;;  %2677 = vmatprep.subr.bf16.mxu0 %v3425_v44  ;;  %v3463_v23 = vcombine.high %v1192_v16, %v1196_v17  ;;  %v3462_v28 = vcombine.low %v1192_v16, %v1196_v17  ;;  %v1221_v43 = vld [vmem:[#allocation11 + $0x668] sm:$0xff]  ;;  %v3478_v44 = vcombine.low %v1208_v33, %v1212_v34 }
 0x502   :  { %v3489_v46 = vcombine.high %v1217_v42, %v1221_v43  ;;  %v3488_v53 = vcombine.low %v1217_v42, %v1221_v43 }
 0x503   :  { %2596 = vmatpush1.bf16.msra.mxu1 %v3422_v48  ;;  %2678 = vmatpush1.bf16.msra.mxu0 %v3424_v49  ;;  %v1224_v48 = vld [vmem:[#allocation11 + $0x680] sm:$0xff] }
 0x504   :  { %2597 = vmatprep.subr.bf16.mxu1 %v3431_v50  ;;  %2679 = vmatprep.subr.bf16.mxu0 %v3433_v51  ;;  %v1228_v49 = vld [vmem:[#allocation11 + $0x6a0] sm:$0xff]  ;;  %v1225_v50 = vld [vmem:[#allocation11 + $0x688] sm:$0xff] }
 0x505   :  { %v1229_v51 = vld [vmem:[#allocation11 + $0x6a8] sm:$0xff]  ;;  %v3495_v54 = vcombine.high %v1224_v48, %v1228_v49  ;;  %v3494_v59 = vcombine.low %v1224_v48, %v1228_v49  ;;  %v4514_v49 = vpack.c.bf16 %v4498_v30, %v4498_v30 }
 0x506   :  { %v3497_v15 = vcombine.high %v1225_v50, %v1229_v51  ;;  %v3496_v9 = vcombine.low %v1225_v50, %v1229_v51 }
 0x507   :  { %2598 = vmatpush1.bf16.msra.mxu1 %v3430_v55  ;;  %2680 = vmatpush1.bf16.msra.mxu0 %v3432_v56  ;;  %v1232_v55 = vld [vmem:[#allocation11 + $0x6c0] sm:$0xff] }
 0x508   :  { %2599 = vmatprep.subr.bf16.mxu1 %v3439_v57  ;;  %2681 = vmatprep.subr.bf16.mxu0 %v3441_v58  ;;  %v1236_v56 = vld [vmem:[#allocation11 + $0x6e0] sm:$0xff]  ;;  %v1233_v57 = vld [vmem:[#allocation11 + $0x6c8] sm:$0xff] }
 0x509   :  { %v1237_v58 = vld [vmem:[#allocation11 + $0x6e8] sm:$0xff]  ;;  %v3503_v60 = vcombine.high %v1232_v55, %v1236_v56  ;;  %v3502_v5 = vcombine.low %v1232_v55, %v1236_v56  ;;  %v1039_v55 = vld [vmem:[#allocation11 + $0xb8] sm:$0xff] }
 0x50a   :  { %v3505_v61 = vcombine.high %v1233_v57, %v1237_v58  ;;  %v3504_v6 = vcombine.low %v1233_v57, %v1237_v58 }
 0x50b   :  { %2600 = vmatpush1.bf16.msra.mxu1 %v3438_v62  ;;  %2682 = vmatpush1.bf16.msra.mxu0 %v3440_v63  ;;  %v1240_v62 = vld [vmem:[#allocation11 + $0x700] sm:$0xff] }
 0x50c   :  { %2601 = vmatprep.subr.bf16.mxu1 %v3447_v4  ;;  %2683 = vmatprep.subr.bf16.mxu0 %v3449_v0  ;;  %v1244_v63 = vld [vmem:[#allocation11 + $0x720] sm:$0xff]  ;;  %v1241_v4 = vld [vmem:[#allocation11 + $0x708] sm:$0xff] }
 0x50d   :  { %v1245_v0 = vld [vmem:[#allocation11 + $0x728] sm:$0xff]  ;;  %v3511_v7 = vcombine.high %v1240_v62, %v1244_v63  ;;  %v3510_v16 = vcombine.low %v1240_v62, %v1244_v63 }
 0x50e   :  { %v3513_v8 = vcombine.high %v1241_v4, %v1245_v0  ;;  %v3512_v17 = vcombine.low %v1241_v4, %v1245_v0 }
 0x50f   :  { %2602 = vmatpush1.bf16.msra.mxu1 %v3446_v11  ;;  %2684 = vmatpush1.bf16.msra.mxu0 %v3448_v12  ;;  %v1248_v11 = vld [vmem:[#allocation11 + $0x740] sm:$0xff] }
 0x510   :  { %2603 = vmatprep.subr.bf16.mxu1 %v3455_v13  ;;  %2685 = vmatprep.subr.bf16.mxu0 %v3457_v14  ;;  %v1252_v12 = vld [vmem:[#allocation11 + $0x760] sm:$0xff]  ;;  %v1249_v13 = vld [vmem:[#allocation11 + $0x748] sm:$0xff] }
 0x511   :  { %v1253_v14 = vld [vmem:[#allocation11 + $0x768] sm:$0xff]  ;;  %v3519_v18 = vcombine.high %v1248_v11, %v1252_v12  ;;  %v3518_v24 = vcombine.low %v1248_v11, %v1252_v12 }
 0x512   :  { %v3521_v19 = vcombine.high %v1249_v13, %v1253_v14  ;;  %v3520_v25 = vcombine.low %v1249_v13, %v1253_v14  ;;  %v1058_v14 = vld [vmem:[#allocation11 + $0x150] sm:$0xff] }
 0x513   :  { %2604 = vmatpush1.bf16.msra.mxu1 %v3454_v21  ;;  %2686 = vmatpush1.bf16.msra.mxu0 %v3456_v22  ;;  %v1256_v21 = vld [vmem:[#allocation11 + $0x780] sm:$0xff] }
 0x514   :  { %2605 = vmatprep.subr.bf16.mxu1 %v3463_v23  ;;  %2687 = vmatprep.subr.bf16.mxu0 %v3465_v10  ;;  %v1260_v22 = vld [vmem:[#allocation11 + $0x7a0] sm:$0xff]  ;;  %v1257_v23 = vld [vmem:[#allocation11 + $0x788] sm:$0xff] }
 0x515   :  { %v1261_v10 = vld [vmem:[#allocation11 + $0x7a8] sm:$0xff]  ;;  %v3527_v26 = vcombine.high %v1256_v21, %v1260_v22  ;;  %v3526_v33 = vcombine.low %v1256_v21, %v1260_v22 }
 0x516   :  { %v3529_v27 = vcombine.high %v1257_v23, %v1261_v10  ;;  %v3528_v34 = vcombine.low %v1257_v23, %v1261_v10  ;;  %v1066_v10 = vld [vmem:[#allocation11 + $0x190] sm:$0xff] }
 0x517   :  { %2606 = vmatpush1.bf16.msra.mxu1 %v3462_v28  ;;  %2688 = vmatpush1.bf16.msra.mxu0 %v3464_v29  ;;  %v1264_v28 = vld [vmem:[#allocation11 + $0x7c0] sm:$0xff] }
 0x518   :  { %2607 = vmatprep.subr.bf16.mxu1 %v3471_v31  ;;  %2689 = vmatprep.subr.bf16.mxu0 %v3473_v32  ;;  %v1268_v29 = vld [vmem:[#allocation11 + $0x7e0] sm:$0xff]  ;;  %v1265_v31 = vld [vmem:[#allocation11 + $0x7c8] sm:$0xff] }
 0x519   :  { %v1269_v32 = vld [vmem:[#allocation11 + $0x7e8] sm:$0xff]  ;;  %v3535_v35 = vcombine.high %v1264_v28, %v1268_v29  ;;  %v3534_v1 = vcombine.low %v1264_v28, %v1268_v29 }
 0x51a   :  { %v3537_v36 = vcombine.high %v1265_v31, %v1269_v32  ;;  %v3536_v2 = vcombine.low %v1265_v31, %v1269_v32  ;;  %v1074_v32 = vld [vmem:[#allocation11 + $0x1d0] sm:$0xff] }
 0x51b   :  { %2608 = vmatpush1.bf16.msra.mxu1 %v3470_v37  ;;  %2690 = vmatpush1.bf16.msra.mxu0 %v3472_v38  ;;  %v1018_v37 = vld [vmem:[#allocation11 + $0x10] sm:$0xff] }
 0x51c   :  { %2609 = vmatprep.subr.bf16.mxu1 %v3479_v39  ;;  %2691 = vmatprep.subr.bf16.mxu0 %v3481_v40  ;;  %v1022_v38 = vld [vmem:[#allocation11 + $0x30] sm:$0xff]  ;;  %v1019_v39 = vld [vmem:[#allocation11 + $0x18] sm:$0xff] }
 0x51d   :  { %v1023_v40 = vld [vmem:[#allocation11 + $0x38] sm:$0xff]  ;;  %v3291_v42 = vcombine.high %v1018_v37, %v1022_v38  ;;  %v3290_v48 = vcombine.low %v1018_v37, %v1022_v38 }
 0x51e   :  { %v3293_v43 = vcombine.high %v1019_v39, %v1023_v40  ;;  %v3292_v50 = vcombine.low %v1019_v39, %v1023_v40  ;;  %v1082_v40 = vld [vmem:[#allocation11 + $0x210] sm:$0xff] }
 0x51f   :  { %2610 = vmatpush1.bf16.msra.mxu1 %v3478_v44  ;;  %2692 = vmatpush1.bf16.msra.mxu0 %v3480_v20  ;;  %v1026_v44 = vld [vmem:[#allocation11 + $0x50] sm:$0xff] }
 0x520   :  { %2611 = vmatprep.subr.bf16.mxu1 %v3487_v45  ;;  %2693 = vmatprep.subr.bf16.mxu0 %v3489_v46  ;;  %v1030_v20 = vld [vmem:[#allocation11 + $0x70] sm:$0xff]  ;;  %v1027_v45 = vld [vmem:[#allocation11 + $0x58] sm:$0xff] }
 0x521   :  { %v1031_v46 = vld [vmem:[#allocation11 + $0x78] sm:$0xff]  ;;  %v3299_v51 = vcombine.high %v1026_v44, %v1030_v20  ;;  %v3298_v56 = vcombine.low %v1026_v44, %v1030_v20 }
 0x522   :  { %v3300_v30 = vcombine.low %v1027_v45, %v1031_v46 }
 0x523   :  { %2612 = vmatpush1.bf16.msra.mxu1 %v3486_v52  ;;  %2694 = vmatpush1.bf16.msra.mxu0 %v3488_v53  ;;  %v3301_v52 = vcombine.high %v1027_v45, %v1031_v46  ;;  %v1034_v53 = vld [vmem:[#allocation11 + $0x90] sm:$0xff] }
 0x524   :  { %2613 = vmatprep.subr.bf16.mxu1 %v3495_v54  ;;  %2695 = vmatprep.subr.bf16.mxu0 %v3497_v15  ;;  %v1038_v54 = vld [vmem:[#allocation11 + $0xb0] sm:$0xff]  ;;  %v1035_v15 = vld [vmem:[#allocation11 + $0x98] sm:$0xff] }
 0x525   :  { %v3307_v57 = vcombine.high %v1034_v53, %v1038_v54  ;;  %v3309_v58 = vcombine.high %v1035_v15, %v1039_v55  ;;  %v3306_v62 = vcombine.low %v1034_v53, %v1038_v54  ;;  %v3308_v63 = vcombine.low %v1035_v15, %v1039_v55  ;;  %v1090_v46 = vld [vmem:[#allocation11 + $0x250] sm:$0xff] }
 0x526   :  { %v1098_v55 = vld [vmem:[#allocation11 + $0x290] sm:$0xff] }
 0x527   :  { %2614 = vmatpush1.bf16.msra.mxu1 %v3494_v59  ;;  %2696 = vmatpush1.bf16.msra.mxu0 %v3496_v9  ;;  %v1042_v59 = vld [vmem:[#allocation11 + $0xd0] sm:$0xff] }
 0x528   :  { %2615 = vmatprep.subr.bf16.mxu1 %v3503_v60  ;;  %2697 = vmatprep.subr.bf16.mxu0 %v3505_v61  ;;  %v1046_v9 = vld [vmem:[#allocation11 + $0xf0] sm:$0xff]  ;;  %v1043_v60 = vld [vmem:[#allocation11 + $0xd8] sm:$0xff] }
 0x529   :  { %v1047_v61 = vld [vmem:[#allocation11 + $0xf8] sm:$0xff]  ;;  %v3315_v4 = vcombine.high %v1042_v59, %v1046_v9 }
 0x52a   :  { %v3317_v0 = vcombine.high %v1043_v60, %v1047_v61  ;;  %v3316_v11 = vcombine.low %v1043_v60, %v1047_v61  ;;  %v1106_v61 = vld [vmem:[#allocation11 + $0x2d0] sm:$0xff] }
 0x52b   :  { %2616 = vmatpush1.bf16.msra.mxu1 %v3502_v5  ;;  %2698 = vmatpush1.bf16.msra.mxu0 %v3504_v6  ;;  %v1050_v5 = vld [vmem:[#allocation11 + $0x110] sm:$0xff] }
 0x52c   :  { %2617 = vmatprep.subr.bf16.mxu1 %v3511_v7  ;;  %2699 = vmatprep.subr.bf16.mxu0 %v3513_v8  ;;  %v1054_v6 = vld [vmem:[#allocation11 + $0x130] sm:$0xff]  ;;  %v1055_v7 = vld [vmem:[#allocation11 + $0x138] sm:$0xff]  ;;  %v3314_v8 = vcombine.low %v1042_v59, %v1046_v9 }
 0x52d   :  { %v3323_v12 = vcombine.high %v1050_v5, %v1054_v6 }
 0x52f   :  { %2618 = vmatpush1.bf16.msra.mxu1 %v3510_v16  ;;  %2700 = vmatpush1.bf16.msra.mxu0 %v3512_v17  ;;  %v1062_v16 = vld [vmem:[#allocation11 + $0x170] sm:$0xff]  ;;  %v1059_v17 = vld [vmem:[#allocation11 + $0x158] sm:$0xff] }
 0x530   :  { %2619 = vmatprep.subr.bf16.mxu1 %v3519_v18  ;;  %2701 = vmatprep.subr.bf16.mxu0 %v3521_v19  ;;  %v1063_v18 = vld [vmem:[#allocation11 + $0x178] sm:$0xff]  ;;  %v3322_v19 = vcombine.low %v1050_v5, %v1054_v6  ;;  %v3331_v22 = vcombine.high %v1058_v14, %v1062_v16 }
 0x531   :  { %v3333_v23 = vcombine.high %v1059_v17, %v1063_v18  ;;  %v3332_v28 = vcombine.low %v1059_v17, %v1063_v18  ;;  %v1122_v18 = vld [vmem:[#allocation11 + $0x350] sm:$0xff] }
 0x533   :  { %2620 = vmatpush1.bf16.msra.mxu1 %v3518_v24  ;;  %2702 = vmatpush1.bf16.msra.mxu0 %v3520_v25  ;;  %v1070_v24 = vld [vmem:[#allocation11 + $0x1b0] sm:$0xff]  ;;  %v1067_v25 = vld [vmem:[#allocation11 + $0x198] sm:$0xff] }
 0x534   :  { %2621 = vmatprep.subr.bf16.mxu1 %v3527_v26  ;;  %2703 = vmatprep.subr.bf16.mxu0 %v3529_v27  ;;  %v1071_v26 = vld [vmem:[#allocation11 + $0x1b8] sm:$0xff]  ;;  %v3330_v27 = vcombine.low %v1058_v14, %v1062_v16  ;;  %v3339_v29 = vcombine.high %v1066_v10, %v1070_v24 }
 0x535   :  { %v3341_v31 = vcombine.high %v1067_v25, %v1071_v26  ;;  %v3340_v37 = vcombine.low %v1067_v25, %v1071_v26  ;;  %v1130_v26 = vld [vmem:[#allocation11 + $0x390] sm:$0xff] }
 0x537   :  { %2622 = vmatpush1.bf16.msra.mxu1 %v3526_v33  ;;  %2704 = vmatpush1.bf16.msra.mxu0 %v3528_v34  ;;  %v1078_v33 = vld [vmem:[#allocation11 + $0x1f0] sm:$0xff]  ;;  %v1075_v34 = vld [vmem:[#allocation11 + $0x1d8] sm:$0xff] }
 0x538   :  { %2623 = vmatprep.subr.bf16.mxu1 %v3535_v35  ;;  %2705 = vmatprep.subr.bf16.mxu0 %v3537_v36  ;;  %v1079_v35 = vld [vmem:[#allocation11 + $0x1f8] sm:$0xff]  ;;  %v3338_v36 = vcombine.low %v1066_v10, %v1070_v24  ;;  %v3347_v38 = vcombine.high %v1074_v32, %v1078_v33 }
 0x539   :  { %v3349_v39 = vcombine.high %v1075_v34, %v1079_v35  ;;  %v3348_v44 = vcombine.low %v1075_v34, %v1079_v35  ;;  %v1138_v35 = vld [vmem:[#allocation11 + $0x3d0] sm:$0xff] }
 0x53b   :  { %2624 = vmatpush1.bf16.msra.mxu1 %v3534_v1  ;;  %2706 = vmatpush1.bf16.msra.mxu0 %v3536_v2  ;;  %v1086_v1 = vld [vmem:[#allocation11 + $0x230] sm:$0xff]  ;;  %v1083_v2 = vld [vmem:[#allocation11 + $0x218] sm:$0xff] }
 0x53c   :  { %2716 = vmatprep.subr.bf16.mxu1 %v3291_v42  ;;  %2798 = vmatprep.subr.bf16.mxu0 %v3293_v43  ;;  %v1087_v42 = vld [vmem:[#allocation11 + $0x238] sm:$0xff]  ;;  %v3346_v43 = vcombine.low %v1074_v32, %v1078_v33  ;;  %v3355_v20 = vcombine.high %v1082_v40, %v1086_v1 }
 0x53d   :  { %v3357_v45 = vcombine.high %v1083_v2, %v1087_v42  ;;  %v3356_v53 = vcombine.low %v1083_v2, %v1087_v42  ;;  %v1146_v42 = vld [vmem:[#allocation11 + $0x410] sm:$0xff] }
 0x53e   :  { %2626 = vmatmul.mubr.bf16.vlgmr.msra.gmra.mrb[16].mxu1 %v4514_v49  ;;  %2708 = vmatmul.mubr.bf16.vlgmr.msra.gmra.mrb[8].mxu0 %v4514_v49 }
 0x53f   :  { %2717 = vmatpush1.bf16.msra.mxu1 %v3290_v48  ;;  %2748 = vmatprep.mubr.bf16.mxu1 %v4500_v3  ;;  %v1094_v48 = vld [vmem:[#allocation11 + $0x270] sm:$0xff] }
 0x540   :  { %2799 = vmatpush1.bf16.msra.mxu0 %v3292_v50  ;;  %2830 = vmatprep.mubr.bf16.mxu0 %v4500_v3  ;;  %v1051_v3 = vld [vmem:[#allocation11 + $0x118] sm:$0xff]  ;;  %v3363_v54 = vcombine.high %v1090_v46, %v1094_v48 }
 0x541   :  { %2718 = vmatprep.subr.bf16.mxu1 %v3299_v51  ;;  %2800 = vmatprep.subr.bf16.mxu0 %v3301_v52  ;;  %v3325_v13 = vcombine.high %v1051_v3, %v1055_v7  ;;  %v3324_v21 = vcombine.low %v1051_v3, %v1055_v7  ;;  %v1091_v50 = vld [vmem:[#allocation11 + $0x258] sm:$0xff]  ;;  %v3354_v52 = vcombine.low %v1082_v40, %v1086_v1  ;;  %v1114_v7 = vld [vmem:[#allocation11 + $0x310] sm:$0xff] }
 0x542   :  { %v1095_v51 = vld [vmem:[#allocation11 + $0x278] sm:$0xff] }
 0x543   :  { %2719 = vmatpush1.bf16.msra.mxu1 %v3298_v56  ;;  %v3365_v15 = vcombine.high %v1091_v50, %v1095_v51  ;;  %v1102_v56 = vld [vmem:[#allocation11 + $0x2b0] sm:$0xff]  ;;  %v3364_v59 = vcombine.low %v1091_v50, %v1095_v51 }
 0x544   :  { %2801 = vmatpush1.bf16.msra.mxu0 %v3300_v30  ;;  %2720 = vmatprep.subr.bf16.mxu1 %v3307_v57  ;;  %v1099_v30 = vld [vmem:[#allocation11 + $0x298] sm:$0xff]  ;;  %v3371_v9 = vcombine.high %v1098_v55, %v1102_v56  ;;  %v1154_v51 = vld [vmem:[#allocation11 + $0x450] sm:$0xff] }
 0x545   :  { %2802 = vmatprep.subr.bf16.mxu0 %v3309_v58  ;;  %v1103_v57 = vld [vmem:[#allocation11 + $0x2b8] sm:$0xff]  ;;  %v3362_v58 = vcombine.low %v1090_v46, %v1094_v48 }
 0x546   :  { %v3373_v60 = vcombine.high %v1099_v30, %v1103_v57  ;;  %v3372_v5 = vcombine.low %v1099_v30, %v1103_v57  ;;  %v1162_v30 = vld [vmem:[#allocation11 + $0x490] sm:$0xff] }
 0x547   :  { %2721 = vmatpush1.bf16.msra.mxu1 %v3306_v62  ;;  %v1110_v62 = vld [vmem:[#allocation11 + $0x2f0] sm:$0xff] }
 0x548   :  { %2803 = vmatpush1.bf16.msra.mxu0 %v3308_v63  ;;  %2722 = vmatprep.subr.bf16.mxu1 %v3315_v4  ;;  %v1107_v63 = vld [vmem:[#allocation11 + $0x2d8] sm:$0xff]  ;;  %v3379_v6 = vcombine.high %v1106_v61, %v1110_v62  ;;  %v1166_v57 = vld [vmem:[#allocation11 + $0x4b0] sm:$0xff] }
 0x549   :  { %2804 = vmatprep.subr.bf16.mxu0 %v3317_v0  ;;  %v1111_v4 = vld [vmem:[#allocation11 + $0x2f8] sm:$0xff]  ;;  %v3370_v0 = vcombine.low %v1098_v55, %v1102_v56 }
 0x54a   :  { %v3381_v3 = vcombine.high %v1107_v63, %v1111_v4  ;;  %v3380_v14 = vcombine.low %v1107_v63, %v1111_v4  ;;  %v1170_v4 = vld [vmem:[#allocation11 + $0x4d0] sm:$0xff] }
 0x54b   :  { %2723 = vmatpush1.bf16.msra.mxu1 %v3314_v8  ;;  %v1118_v8 = vld [vmem:[#allocation11 + $0x330] sm:$0xff] }
 0x54c   :  { %2805 = vmatpush1.bf16.msra.mxu0 %v3316_v11  ;;  %2724 = vmatprep.subr.bf16.mxu1 %v3323_v12  ;;  %v1115_v11 = vld [vmem:[#allocation11 + $0x318] sm:$0xff]  ;;  %v3387_v16 = vcombine.high %v1114_v7, %v1118_v8 }
 0x54d   :  { %2806 = vmatprep.subr.bf16.mxu0 %v3325_v13  ;;  %v1119_v12 = vld [vmem:[#allocation11 + $0x338] sm:$0xff]  ;;  %v3378_v13 = vcombine.low %v1106_v61, %v1110_v62  ;;  %v3435_v62 = vcombine.high %v1162_v30, %v1166_v57 }
 0x54e   :  { %v3389_v17 = vcombine.high %v1115_v11, %v1119_v12  ;;  %v3388_v10 = vcombine.low %v1115_v11, %v1119_v12  ;;  %v1178_v11 = vld [vmem:[#allocation11 + $0x510] sm:$0xff] }
 0x54f   :  { %2725 = vmatpush1.bf16.msra.mxu1 %v3322_v19  ;;  %v1126_v19 = vld [vmem:[#allocation11 + $0x370] sm:$0xff] }
 0x550   :  { %2807 = vmatpush1.bf16.msra.mxu0 %v3324_v21  ;;  %2726 = vmatprep.subr.bf16.mxu1 %v3331_v22  ;;  %v1123_v21 = vld [vmem:[#allocation11 + $0x358] sm:$0xff]  ;;  %v3395_v24 = vcombine.high %v1122_v18, %v1126_v19  ;;  %v1182_v12 = vld [vmem:[#allocation11 + $0x530] sm:$0xff] }
 0x551   :  { %2808 = vmatprep.subr.bf16.mxu0 %v3333_v23  ;;  %v1127_v22 = vld [vmem:[#allocation11 + $0x378] sm:$0xff]  ;;  %v3386_v23 = vcombine.low %v1114_v7, %v1118_v8 }
 0x552   :  { %v3397_v25 = vcombine.high %v1123_v21, %v1127_v22  ;;  %v3396_v32 = vcombine.low %v1123_v21, %v1127_v22  ;;  %v1190_v21 = vld [vmem:[#allocation11 + $0x570] sm:$0xff]  ;;  %v1187_v22 = vld [vmem:[#allocation11 + $0x558] sm:$0xff] }
 0x553   :  { %2727 = vmatpush1.bf16.msra.mxu1 %v3330_v27  ;;  %v1134_v27 = vld [vmem:[#allocation11 + $0x3b0] sm:$0xff] }
 0x554   :  { %2809 = vmatpush1.bf16.msra.mxu0 %v3332_v28  ;;  %2728 = vmatprep.subr.bf16.mxu1 %v3339_v29  ;;  %v1131_v28 = vld [vmem:[#allocation11 + $0x398] sm:$0xff]  ;;  %v3403_v33 = vcombine.high %v1130_v26, %v1134_v27 }
 0x555   :  { %2810 = vmatprep.subr.bf16.mxu0 %v3341_v31  ;;  %v1135_v29 = vld [vmem:[#allocation11 + $0x3b8] sm:$0xff]  ;;  %v3394_v31 = vcombine.low %v1122_v18, %v1126_v19  ;;  %v1186_v19 = vld [vmem:[#allocation11 + $0x550] sm:$0xff] }
 0x556   :  { %v3405_v34 = vcombine.high %v1131_v28, %v1135_v29  ;;  %v3404_v40 = vcombine.low %v1131_v28, %v1135_v29  ;;  %v1198_v28 = vld [vmem:[#allocation11 + $0x5b0] sm:$0xff]  ;;  %v1195_v29 = vld [vmem:[#allocation11 + $0x598] sm:$0xff] }
 0x557   :  { %2729 = vmatpush1.bf16.msra.mxu1 %v3338_v36  ;;  %v1142_v36 = vld [vmem:[#allocation11 + $0x3f0] sm:$0xff] }
 0x558   :  { %2811 = vmatpush1.bf16.msra.mxu0 %v3340_v37  ;;  %2730 = vmatprep.subr.bf16.mxu1 %v3347_v38  ;;  %v1139_v37 = vld [vmem:[#allocation11 + $0x3d8] sm:$0xff]  ;;  %v3411_v1 = vcombine.high %v1138_v35, %v1142_v36 }
 0x559   :  { %2812 = vmatprep.subr.bf16.mxu0 %v3349_v39  ;;  %v1143_v38 = vld [vmem:[#allocation11 + $0x3f8] sm:$0xff]  ;;  %v3402_v39 = vcombine.low %v1130_v26, %v1134_v27  ;;  %v1194_v27 = vld [vmem:[#allocation11 + $0x590] sm:$0xff] }
 0x55a   :  { %v3413_v2 = vcombine.high %v1139_v37, %v1143_v38  ;;  %v3412_v46 = vcombine.low %v1139_v37, %v1143_v38  ;;  %v1206_v37 = vld [vmem:[#allocation11 + $0x5f0] sm:$0xff]  ;;  %v1203_v38 = vld [vmem:[#allocation11 + $0x5d8] sm:$0xff] }
 0x55b   :  { %2731 = vmatpush1.bf16.msra.mxu1 %v3346_v43  ;;  %v1150_v43 = vld [vmem:[#allocation11 + $0x430] sm:$0xff] }
 0x55c   :  { %2813 = vmatpush1.bf16.msra.mxu0 %v3348_v44  ;;  %2732 = vmatprep.subr.bf16.mxu1 %v3355_v20  ;;  %v1147_v44 = vld [vmem:[#allocation11 + $0x418] sm:$0xff]  ;;  %v3419_v48 = vcombine.high %v1146_v42, %v1150_v43 }
 0x55d   :  { %2814 = vmatprep.subr.bf16.mxu0 %v3357_v45  ;;  %v1151_v20 = vld [vmem:[#allocation11 + $0x438] sm:$0xff]  ;;  %v3410_v45 = vcombine.low %v1138_v35, %v1142_v36  ;;  %v1202_v36 = vld [vmem:[#allocation11 + $0x5d0] sm:$0xff] }
 0x55e   :  { %v3421_v50 = vcombine.high %v1147_v44, %v1151_v20  ;;  %v3420_v55 = vcombine.low %v1147_v44, %v1151_v20  ;;  %v1214_v44 = vld [vmem:[#allocation11 + $0x630] sm:$0xff]  ;;  %v1211_v20 = vld [vmem:[#allocation11 + $0x618] sm:$0xff] }
 0x55f   :  { %2733 = vmatpush1.bf16.msra.mxu1 %v3354_v52  ;;  %v1158_v52 = vld [vmem:[#allocation11 + $0x470] sm:$0xff] }
 0x560   :  { %2815 = vmatpush1.bf16.msra.mxu0 %v3356_v53  ;;  %2734 = vmatprep.subr.bf16.mxu1 %v3363_v54  ;;  %v3418_v53 = vcombine.low %v1146_v42, %v1150_v43  ;;  %v1155_v54 = vld [vmem:[#allocation11 + $0x458] sm:$0xff]  ;;  %v3427_v56 = vcombine.high %v1154_v51, %v1158_v52  ;;  %v1210_v43 = vld [vmem:[#allocation11 + $0x610] sm:$0xff] }
 0x561   :  { %2816 = vmatprep.subr.bf16.mxu0 %v3365_v15  ;;  %v1159_v15 = vld [vmem:[#allocation11 + $0x478] sm:$0xff] }
 0x562   :  { %v3428_v61 = vcombine.low %v1155_v54, %v1159_v15 }
 0x563   :  { %2735 = vmatpush1.bf16.msra.mxu1 %v3362_v58  ;;  %v3429_v58 = vcombine.high %v1155_v54, %v1159_v15  ;;  %v1219_v54 = vld [vmem:[#allocation11 + $0x658] sm:$0xff] }
 0x564   :  { %2817 = vmatpush1.bf16.msra.mxu0 %v3364_v59  ;;  %2736 = vmatprep.subr.bf16.mxu1 %v3371_v9  ;;  %v1163_v59 = vld [vmem:[#allocation11 + $0x498] sm:$0xff] }
 0x565   :  { %2818 = vmatprep.subr.bf16.mxu0 %v3373_v60  ;;  %v1167_v9 = vld [vmem:[#allocation11 + $0x4b8] sm:$0xff]  ;;  %v3426_v60 = vcombine.low %v1154_v51, %v1158_v52  ;;  %v1218_v52 = vld [vmem:[#allocation11 + $0x650] sm:$0xff] }
 0x566   :  { %v3437_v63 = vcombine.high %v1163_v59, %v1167_v9  ;;  %v1223_v15 = vld [vmem:[#allocation11 + $0x678] sm:$0xff] }
 0x567   :  { %2737 = vmatpush1.bf16.msra.mxu1 %v3370_v0  ;;  %v1174_v0 = vld [vmem:[#allocation11 + $0x4f0] sm:$0xff] }
 0x568   :  { %2819 = vmatpush1.bf16.msra.mxu0 %v3372_v5  ;;  %2738 = vmatprep.subr.bf16.mxu1 %v3379_v6  ;;  %v1171_v5 = vld [vmem:[#allocation11 + $0x4d8] sm:$0xff]  ;;  %v3443_v7 = vcombine.high %v1170_v4, %v1174_v0 }
 0x569   :  { %2820 = vmatprep.subr.bf16.mxu0 %v3381_v3  ;;  %v1175_v6 = vld [vmem:[#allocation11 + $0x4f8] sm:$0xff]  ;;  %v3434_v3 = vcombine.low %v1162_v30, %v1166_v57  ;;  %v3493_v57 = vcombine.high %v1219_v54, %v1223_v15 }
 0x56a   :  { %v3445_v8 = vcombine.high %v1171_v5, %v1175_v6 }
 0x56b   :  { %2739 = vmatpush1.bf16.msra.mxu1 %v3378_v13  ;;  %v1179_v13 = vld [vmem:[#allocation11 + $0x518] sm:$0xff] }
 0x56c   :  { %2821 = vmatpush1.bf16.msra.mxu0 %v3380_v14  ;;  %2740 = vmatprep.subr.bf16.mxu1 %v3387_v16  ;;  %v1183_v14 = vld [vmem:[#allocation11 + $0x538] sm:$0xff]  ;;  %v3444_v16 = vcombine.low %v1171_v5, %v1175_v6  ;;  %v1238_v5 = vld [vmem:[#allocation11 + $0x6f0] sm:$0xff] }
 0x56d   :  { %2822 = vmatprep.subr.bf16.mxu0 %v3389_v17  ;;  %v3451_v17 = vcombine.high %v1178_v11, %v1182_v12  ;;  %v3453_v18 = vcombine.high %v1179_v13, %v1183_v14  ;;  %v1235_v6 = vld [vmem:[#allocation11 + $0x6d8] sm:$0xff] }
 0x56f   :  { %2741 = vmatpush1.bf16.msra.mxu1 %v3386_v23  ;;  %v1191_v23 = vld [vmem:[#allocation11 + $0x578] sm:$0xff] }
 0x570   :  { %2823 = vmatpush1.bf16.msra.mxu0 %v3388_v10  ;;  %2742 = vmatprep.subr.bf16.mxu1 %v3395_v24  ;;  %v3450_v10 = vcombine.low %v1178_v11, %v1182_v12  ;;  %v3452_v24 = vcombine.low %v1179_v13, %v1183_v14  ;;  %v3461_v26 = vcombine.high %v1187_v22, %v1191_v23  ;;  %v1242_v12 = vld [vmem:[#allocation11 + $0x710] sm:$0xff]  ;;  %v1243_v14 = vld [vmem:[#allocation11 + $0x718] sm:$0xff] }
 0x571   :  { %2824 = vmatprep.subr.bf16.mxu0 %v3397_v25  ;;  %v3459_v25 = vcombine.high %v1186_v19, %v1190_v21  ;;  %v1246_v13 = vld [vmem:[#allocation11 + $0x730] sm:$0xff] }
 0x573   :  { %2743 = vmatpush1.bf16.msra.mxu1 %v3394_v31  ;;  %v1199_v31 = vld [vmem:[#allocation11 + $0x5b8] sm:$0xff] }
 0x574   :  { %2825 = vmatpush1.bf16.msra.mxu0 %v3396_v32  ;;  %2744 = vmatprep.subr.bf16.mxu1 %v3403_v33  ;;  %v3458_v32 = vcombine.low %v1186_v19, %v1190_v21  ;;  %v3460_v33 = vcombine.low %v1187_v22, %v1191_v23  ;;  %v3469_v35 = vcombine.high %v1195_v29, %v1199_v31  ;;  %v1250_v21 = vld [vmem:[#allocation11 + $0x750] sm:$0xff]  ;;  %v1251_v23 = vld [vmem:[#allocation11 + $0x758] sm:$0xff] }
 0x575   :  { %2826 = vmatprep.subr.bf16.mxu0 %v3405_v34  ;;  %v3467_v34 = vcombine.high %v1194_v27, %v1198_v28  ;;  %v1254_v22 = vld [vmem:[#allocation11 + $0x770] sm:$0xff] }
 0x577   :  { %2745 = vmatpush1.bf16.msra.mxu1 %v3402_v39  ;;  %v1207_v39 = vld [vmem:[#allocation11 + $0x5f8] sm:$0xff] }
 0x578   :  { %2827 = vmatpush1.bf16.msra.mxu0 %v3404_v40  ;;  %2746 = vmatprep.subr.bf16.mxu1 %v3411_v1  ;;  %v3466_v40 = vcombine.low %v1194_v27, %v1198_v28  ;;  %v3468_v1 = vcombine.low %v1195_v29, %v1199_v31  ;;  %v3477_v42 = vcombine.high %v1203_v38, %v1207_v39  ;;  %v1258_v28 = vld [vmem:[#allocation11 + $0x790] sm:$0xff]  ;;  %v1259_v31 = vld [vmem:[#allocation11 + $0x798] sm:$0xff] }
 0x579   :  { %2828 = vmatprep.subr.bf16.mxu0 %v3413_v2  ;;  %v3475_v2 = vcombine.high %v1202_v36, %v1206_v37  ;;  %v1262_v29 = vld [vmem:[#allocation11 + $0x7b0] sm:$0xff] }
 0x57b   :  { %2747 = vmatpush1.bf16.msra.mxu1 %v3410_v45  ;;  %v1215_v45 = vld [vmem:[#allocation11 + $0x638] sm:$0xff] }
 0x57c   :  { %2829 = vmatpush1.bf16.msra.mxu0 %v3412_v46  ;;  %2757 = vmatprep.subr.bf16.mxu1 %v3419_v48  ;;  %v3474_v46 = vcombine.low %v1202_v36, %v1206_v37  ;;  %v3476_v48 = vcombine.low %v1203_v38, %v1207_v39  ;;  %v3485_v51 = vcombine.high %v1211_v20, %v1215_v45  ;;  %v1266_v37 = vld [vmem:[#allocation11 + $0x7d0] sm:$0xff]  ;;  %v1267_v39 = vld [vmem:[#allocation11 + $0x7d8] sm:$0xff] }
 0x57d   :  { %2839 = vmatprep.subr.bf16.mxu0 %v3421_v50  ;;  %v3483_v50 = vcombine.high %v1210_v43, %v1214_v44  ;;  %v1270_v38 = vld [vmem:[#allocation11 + $0x7f0] sm:$0xff] }
 0x57e   :  { %2749 = vmatmul.mubr.bf16.vlgmr.msra.gmra.mrb[20].mxu1 %v4502_v41 }
 0x57f   :  { %2831 = vmatmul.mubr.bf16.vlgmr.msra.gmra.mrb[12].mxu0 %v4502_v41  ;;  %2758 = vmatpush1.bf16.msra.mxu1 %v3418_v53  ;;  %v3436_v41 = vcombine.low %v1163_v59, %v1167_v9  ;;  %v1222_v53 = vld [vmem:[#allocation11 + $0x670] sm:$0xff]  ;;  %v1227_v9 = vld [vmem:[#allocation11 + $0x698] sm:$0xff] }
 0x580   :  { %2789 = vmatprep.mubr.bf16.mxu1 %v4506_v47  ;;  %2840 = vmatpush1.bf16.msra.mxu0 %v3420_v55  ;;  %v3482_v55 = vcombine.low %v1210_v43, %v1214_v44  ;;  %v3491_v30 = vcombine.high %v1218_v52, %v1222_v53  ;;  %v1230_v59 = vld [vmem:[#allocation11 + $0x6b0] sm:$0xff]  ;;  %v3538_v44 = vcombine.low %v1266_v37, %v1270_v38 }
 0x581   :  { %2871 = vmatprep.mubr.bf16.mxu0 %v4506_v47  ;;  %2759 = vmatprep.subr.bf16.mxu1 %v3427_v56  ;;  %v3442_v47 = vcombine.low %v1170_v4, %v1174_v0  ;;  %v3484_v56 = vcombine.low %v1211_v20, %v1215_v45  ;;  %v1234_v0 = vld [vmem:[#allocation11 + $0x6d0] sm:$0xff]  ;;  %v3901_v45 = vld [vmem:[#allocation13 + $0x40] sm:$0xff]  }
 0x582   :  { %2841 = vmatprep.subr.bf16.mxu0 %v3429_v58  ;;  %v1226_v58 = vld [vmem:[#allocation11 + $0x690] sm:$0xff] }
 0x583   :  { %2760 = vmatpush1.bf16.msra.mxu1 %v3426_v60  ;;  %v1231_v60 = vld [vmem:[#allocation11 + $0x6b8] sm:$0xff] }
 0x584   :  { %2842 = vmatpush1.bf16.msra.mxu0 %v3428_v61  ;;  %2761 = vmatprep.subr.bf16.mxu1 %v3435_v62  ;;  %v3490_v61 = vcombine.low %v1218_v52, %v1222_v53  ;;  %v3492_v62 = vcombine.low %v1219_v54, %v1223_v15  ;;  %v3501_v4 = vcombine.high %v1227_v9, %v1231_v60  ;;  %v3906_v52 = vld [vmem:[#allocation13 + $0xc8] sm:$0xff]   ;;  %v3909_v15 = vld [vmem:[#allocation13 + $0x50] sm:$0xff]  }
 0x585   :  { %2843 = vmatprep.subr.bf16.mxu0 %v3437_v63  ;;  %v3499_v63 = vcombine.high %v1226_v58, %v1230_v59  ;;  %v3907_v53 = vld [vmem:[#allocation13 + $0x8] sm:$0xff]  }
 0x586   :  { %v3908_v54 = vld [vmem:[#allocation13 + $0x88] sm:$0xff]  }
 0x587   :  { %2762 = vmatpush1.bf16.msra.mxu1 %v3434_v3  ;;  %v1239_v3 = vld [vmem:[#allocation11 + $0x6f8] sm:$0xff] }
 0x588   :  { %2844 = vmatpush1.bf16.msra.mxu0 %v3436_v41  ;;  %2763 = vmatprep.subr.bf16.mxu1 %v3443_v7  ;;  %v3498_v41 = vcombine.low %v1226_v58, %v1230_v59  ;;  %v3500_v7 = vcombine.low %v1227_v9, %v1231_v60  ;;  %v3509_v11 = vcombine.high %v1235_v6, %v1239_v3  ;;  %v3914_v58 = vld [vmem:[#allocation13 + $0xd8] sm:$0xff]   ;;  %v3917_v9 = vld [vmem:[#allocation13 + $0x60] sm:$0xff]  }
 0x589   :  { %2845 = vmatprep.subr.bf16.mxu0 %v3445_v8  ;;  %v3507_v8 = vcombine.high %v1234_v0, %v1238_v5  ;;  %v3915_v59 = vld [vmem:[#allocation13 + $0x18] sm:$0xff]   ;;  %v3918_v60 = vld [vmem:[#allocation13 + $0xe0] sm:$0xff]  }
 0x58b   :  { %2764 = vmatpush1.bf16.msra.mxu1 %v3442_v47  ;;  %v1247_v47 = vld [vmem:[#allocation11 + $0x738] sm:$0xff] }
 0x58c   :  { %2846 = vmatpush1.bf16.msra.mxu0 %v3444_v16  ;;  %2765 = vmatprep.subr.bf16.mxu1 %v3451_v17  ;;  %v3506_v16 = vcombine.low %v1234_v0, %v1238_v5  ;;  %v3508_v17 = vcombine.low %v1235_v6, %v1239_v3  ;;  %v3517_v19 = vcombine.high %v1243_v14, %v1247_v47  ;;  %v3923_v0 = vld [vmem:[#allocation13 + $0x28] sm:$0xff]  }
 0x58d   :  { %2847 = vmatprep.subr.bf16.mxu0 %v3453_v18  ;;  %v3515_v18 = vcombine.high %v1242_v12, %v1246_v13  ;;  %v3924_v5 = vld [vmem:[#allocation13 + $0xa8] sm:$0xff]  }
 0x58f   :  { %2766 = vmatpush1.bf16.msra.mxu1 %v3450_v10  ;;  %v1255_v10 = vld [vmem:[#allocation11 + $0x778] sm:$0xff] }
 0x590   :  { %2848 = vmatpush1.bf16.msra.mxu0 %v3452_v24  ;;  %2767 = vmatprep.subr.bf16.mxu1 %v3459_v25  ;;  %v3514_v24 = vcombine.low %v1242_v12, %v1246_v13  ;;  %v3516_v25 = vcombine.low %v1243_v14, %v1247_v47  ;;  %v3525_v27 = vcombine.high %v1251_v23, %v1255_v10  ;;  %v3927_v14 = vld [vmem:[#allocation13 + $0x30] sm:$0xff]  }
 0x591   :  { %2849 = vmatprep.subr.bf16.mxu0 %v3461_v26  ;;  %v3523_v26 = vcombine.high %v1250_v21, %v1254_v22  ;;  %v3928_v47 = vld [vmem:[#allocation13 + $0xb0] sm:$0xff]  }
 0x593   :  { %2768 = vmatpush1.bf16.msra.mxu1 %v3458_v32  ;;  %v1263_v32 = vld [vmem:[#allocation11 + $0x7b8] sm:$0xff] }
 0x594   :  { %2850 = vmatpush1.bf16.msra.mxu0 %v3460_v33  ;;  %2769 = vmatprep.subr.bf16.mxu1 %v3467_v34  ;;  %v3522_v33 = vcombine.low %v1250_v21, %v1254_v22  ;;  %v3524_v34 = vcombine.low %v1251_v23, %v1255_v10  ;;  %v3533_v36 = vcombine.high %v1259_v31, %v1263_v32  ;;  %v3931_v21 = vld [vmem:[#allocation13 + $0x38] sm:$0xff]  }
 0x595   :  { %2851 = vmatprep.subr.bf16.mxu0 %v3469_v35  ;;  %v3531_v35 = vcombine.high %v1258_v28, %v1262_v29  ;;  %v3932_v22 = vld [vmem:[#allocation13 + $0xb8] sm:$0xff]  }
 0x597   :  { %2770 = vmatpush1.bf16.msra.mxu1 %v3466_v40  ;;  %v1271_v40 = vld [vmem:[#allocation11 + $0x7f8] sm:$0xff] }
 0x598   :  { %2852 = vmatpush1.bf16.msra.mxu0 %v3468_v1  ;;  %2771 = vmatprep.subr.bf16.mxu1 %v3475_v2  ;;  %v3530_v1 = vcombine.low %v1258_v28, %v1262_v29  ;;  %v3532_v2 = vcombine.low %v1259_v31, %v1263_v32  ;;  %v3541_v43 = vcombine.high %v1267_v39, %v1271_v40 }
 0x599   :  { %2853 = vmatprep.subr.bf16.mxu0 %v3477_v42  ;;  %v3539_v42 = vcombine.high %v1266_v37, %v1270_v38  ;;  %v3540_v20 = vcombine.low %v1267_v39, %v1271_v40 }
 0x59b   :  { %2772 = vmatpush1.bf16.msra.mxu1 %v3474_v46  ;;  %v3902_v46 = vld [vmem:[#allocation13 + $0xc0] sm:$0xff]  }
 0x59c   :  { %2854 = vmatpush1.bf16.msra.mxu0 %v3476_v48  ;;  %2773 = vmatprep.subr.bf16.mxu1 %v3483_v50  ;;  %v3903_v48 = vld [vmem:[#allocation13] sm:$0xff]  }
 0x59d   :  { %2855 = vmatprep.subr.bf16.mxu0 %v3485_v51  ;;  %v3904_v50 = vld [vmem:[#allocation13 + $0x80] sm:$0xff]   ;;  %v3905_v51 = vld [vmem:[#allocation13 + $0x48] sm:$0xff]  }
 0x59f   :  { %2774 = vmatpush1.bf16.msra.mxu1 %v3482_v55  ;;  %v3910_v55 = vld [vmem:[#allocation13 + $0xd0] sm:$0xff]  }
 0x5a0   :  { %2856 = vmatpush1.bf16.msra.mxu0 %v3484_v56  ;;  %2775 = vmatprep.subr.bf16.mxu1 %v3491_v30  ;;  %v3911_v56 = vld [vmem:[#allocation13 + $0x10] sm:$0xff]  }
 0x5a1   :  { %2857 = vmatprep.subr.bf16.mxu0 %v3493_v57  ;;  %v3912_v30 = vld [vmem:[#allocation13 + $0x90] sm:$0xff]   ;;  %v3913_v57 = vld [vmem:[#allocation13 + $0x58] sm:$0xff]  }
 0x5a3   :  { %2776 = vmatpush1.bf16.msra.mxu1 %v3490_v61  ;;  %v3919_v61 = vld [vmem:[#allocation13 + $0x20] sm:$0xff]  }
 0x5a4   :  { %2858 = vmatpush1.bf16.msra.mxu0 %v3492_v62  ;;  %2777 = vmatprep.subr.bf16.mxu1 %v3499_v63  ;;  %v3920_v62 = vld [vmem:[#allocation13 + $0xa0] sm:$0xff]   ;;  %v3921_v63 = vld [vmem:[#allocation13 + $0x68] sm:$0xff]  }
 0x5a5   :  { %2859 = vmatprep.subr.bf16.mxu0 %v3501_v4  ;;  %v3922_v4 = vld [vmem:[#allocation13 + $0xe8] sm:$0xff]  }
 0x5a7   :  { %2778 = vmatpush1.bf16.msra.mxu1 %v3498_v41 }
 0x5a8   :  { %2860 = vmatpush1.bf16.msra.mxu0 %v3500_v7  ;;  %2779 = vmatprep.subr.bf16.mxu1 %v3507_v8  ;;  %v3925_v8 = vld [vmem:[#allocation13 + $0x70] sm:$0xff]  }
 0x5a9   :  { %2861 = vmatprep.subr.bf16.mxu0 %v3509_v11  ;;  %v3926_v11 = vld [vmem:[#allocation13 + $0xf0] sm:$0xff]  }
 0x5ab   :  { %2780 = vmatpush1.bf16.msra.mxu1 %v3506_v16 }
 0x5ac   :  { %2862 = vmatpush1.bf16.msra.mxu0 %v3508_v17  ;;  %2781 = vmatprep.subr.bf16.mxu1 %v3515_v18  ;;  %v3929_v18 = vld [vmem:[#allocation13 + $0x78] sm:$0xff]  }
 0x5ad   :  { %2863 = vmatprep.subr.bf16.mxu0 %v3517_v19  ;;  %v3930_v19 = vld [vmem:[#allocation13 + $0xf8] sm:$0xff]  }
 0x5af   :  { %2782 = vmatpush1.bf16.msra.mxu1 %v3514_v24 }
 0x5b0   :  { %2864 = vmatpush1.bf16.msra.mxu0 %v3516_v25  ;;  %2783 = vmatprep.subr.bf16.mxu1 %v3523_v26 }
 0x5b1   :  { %2865 = vmatprep.subr.bf16.mxu0 %v3525_v27 }
 0x5b3   :  { %2784 = vmatpush1.bf16.msra.mxu1 %v3522_v33 }
 0x5b4   :  { %2866 = vmatpush1.bf16.msra.mxu0 %v3524_v34  ;;  %2785 = vmatprep.subr.bf16.mxu1 %v3531_v35 }
 0x5b5   :  { %2867 = vmatprep.subr.bf16.mxu0 %v3533_v36 }
 0x5b7   :  { %2786 = vmatpush1.bf16.msra.mxu1 %v3530_v1 }
 0x5b8   :  { %2868 = vmatpush1.bf16.msra.mxu0 %v3532_v2  ;;  %2787 = vmatprep.subr.bf16.mxu1 %v3539_v42 }
 0x5b9   :  { %2869 = vmatprep.subr.bf16.mxu0 %v3541_v43 }
 0x5bb   :  { %2788 = vmatpush1.bf16.msra.mxu1 %v3538_v44 }
 0x5bc   :  { %2870 = vmatpush1.bf16.msra.mxu0 %v3540_v20  ;;  %3618 = vmatprep.subr.bf16.mxu1 %v3901_v45 }
 0x5bd   :  { %3640 = vmatprep.subr.bf16.mxu0 %v3902_v46 }
 0x5be   :  { %2790 = vmatmul.mubr.bf16.vlgmr.msra.gmra.mrb[20].mxu1 %v4514_v49 }
 0x5bf   :  { %2872 = vmatmul.mubr.bf16.vlgmr.msra.gmra.mrb[12].mxu0 %v4514_v49  ;;  %3619 = vmatpush3.bf16.msra.mxu1 %v3903_v48  ;;  %v3916_v49 = vld [vmem:[#allocation13 + $0x98] sm:$0xff]   ;;  %v3542_v48 = vld [vmem:[%s4554_s13] ss:$0 sm:$0xff] }
 0x5c0   :  { %3641 = vmatpush3.bf16.msra.mxu0 %v3904_v50  ;;  %3620 = vmatprep.subr.bf16.mxu1 %v3905_v51 }
 0x5c1   :  { %3642 = vmatprep.subr.bf16.mxu0 %v3906_v52 }
 0x5c3   :  { %3621 = vmatpush3.bf16.msra.mxu1 %v3907_v53 }
 0x5c4   :  { %3643 = vmatpush3.bf16.msra.mxu0 %v3908_v54  ;;  %3622 = vmatprep.subr.bf16.mxu1 %v3909_v15 }
 0x5c5   :  { %3644 = vmatprep.subr.bf16.mxu0 %v3910_v55 }
 0x5c7   :  { %3623 = vmatpush3.bf16.msra.mxu1 %v3911_v56 }
 0x5c8   :  { %3645 = vmatpush3.bf16.msra.mxu0 %v3912_v30  ;;  %3624 = vmatprep.subr.bf16.mxu1 %v3913_v57 }
 0x5c9   :  { %3646 = vmatprep.subr.bf16.mxu0 %v3914_v58 }
 0x5cb   :  { %3625 = vmatpush3.bf16.msra.mxu1 %v3915_v59 }
 0x5cc   :  { %3647 = vmatpush3.bf16.msra.mxu0 %v3916_v49  ;;  %3626 = vmatprep.subr.bf16.mxu1 %v3917_v9 }
 0x5cd   :  { %3648 = vmatprep.subr.bf16.mxu0 %v3918_v60 }
 0x5cf   :  { %3627 = vmatpush3.bf16.msra.mxu1 %v3919_v61 }
 0x5d0   :  { %3649 = vmatpush3.bf16.msra.mxu0 %v3920_v62  ;;  %3628 = vmatprep.subr.bf16.mxu1 %v3921_v63 }
 0x5d1   :  { %3650 = vmatprep.subr.bf16.mxu0 %v3922_v4 }
 0x5d3   :  { %3629 = vmatpush3.bf16.msra.mxu1 %v3923_v0 }
 0x5d4   :  { %3651 = vmatpush3.bf16.msra.mxu0 %v3924_v5  ;;  %3630 = vmatprep.subr.bf16.mxu1 %v3925_v8 }
 0x5d5   :  { %3652 = vmatprep.subr.bf16.mxu0 %v3926_v11 }
 0x5d7   :  { %3631 = vmatpush3.bf16.msra.mxu1 %v3927_v14 }
 0x5d8   :  { %3653 = vmatpush3.bf16.msra.mxu0 %v3928_v47  ;;  %3632 = vmatprep.subr.bf16.mxu1 %v3929_v18 }
 0x5d9   :  { %3654 = vmatprep.subr.bf16.mxu0 %v3930_v19 }
 0x5db   :  { %3633 = vmatpush3.bf16.msra.mxu1 %v3931_v21 }
 0x5dc   :  { %3655 = vmatpush3.bf16.msra.mxu0 %v3932_v22 }
 0x611   :  { %v2627_v6 = vpop.f32.mrb[16].mxu1  ;;  %v2709_v3 = vpop.f32.mrb[8].mxu0 }
 0x612   :  { %v2629_v41 = vpop.f32.mrb[17].mxu1  ;;  %v2711_v7 = vpop.f32.mrb[9].mxu0  ;;  %v2880_v10 = vmul.f32 %v2627_v6, %v2627_v6  ;;  %v2882_v27 = vmul.f32 %v2709_v3, %v2709_v3 }
 0x613   :  { %v2631_v12 = vpop.f32.mrb[18].mxu1  ;;  %v2713_v13 = vpop.f32.mrb[10].mxu0  ;;  %v2881_v28 = vmul.f32 %v2629_v41, %v2629_v41  ;;  %v2883_v34 = vmul.f32 %v2711_v7, %v2711_v7 }
 0x614   :  { %v2632_v16 = vpop.f32.mrb[19].mxu1  ;;  %v2714_v17 = vpop.f32.mrb[11].mxu0 }
 0x691   :  { %v2791_v23 = vpop.f32.mrb[20].mxu1 }
 0x692   :  { %v2884_v24 = vmul.f32 %v2791_v23, %v2791_v23  ;;  %v2873_v25 = vpop.f32.mrb[12].mxu0  ;;  %v2793_v26 = vpop.f32.mrb[21].mxu1 }
 0x693   :  { %v2886_v29 = vmul.f32 %v2873_v25, %v2873_v25  ;;  %v2885_v31 = vmul.f32 %v2793_v26, %v2793_v26  ;;  %v2875_v32 = vpop.f32.mrb[13].mxu0  ;;  %v2795_v33 = vpop.f32.mrb[22].mxu1 }
 0x694   :  { %v2888_v35 = vadd.f32 %v2884_v24, %v2880_v10  ;;  %v2887_v36 = vmul.f32 %v2875_v32, %v2875_v32  ;;  %v2877_v37 = vpop.f32.mrb[14].mxu0  ;;  %v2796_v38 = vpop.f32.mrb[23].mxu1 }
 0x695   :  { %v2890_v39 = vadd.f32 %v2886_v29, %v2882_v27  ;;  %v2889_v40 = vadd.f32 %v2885_v31, %v2881_v28  ;;  %v2878_v1 = vpop.f32.mrb[15].mxu0 }
 0x696   :  { %v2891_v2 = vadd.f32 %v2887_v36, %v2883_v34  ;;  %v2892_v43 = vpack.c.bf16 %v2888_v35, %v2888_v35 }
 0x697   :  { %v2893_v42 = vpack.c.bf16 %v2889_v40, %v2889_v40  ;;  %v2894_v20 = vpack.c.bf16 %v2890_v39, %v2890_v39 }
 0x698   :  { %v2895_v44 = vpack.c.bf16 %v2891_v2, %v2891_v2 }
 0x699   :  { %3191 = vmatprep.mubr.bf16.mxu1 %v2893_v42 }
 0x69a   :  { %3231 = vmatprep.mubr.bf16.mxu0 %v2895_v44  ;;  %3192 = vmatmul.mubr.bf16.vlgmr.msra.gmra.mrb[24].mxu1 %v2892_v43 }
 0x69b   :  { %3232 = vmatmul.mubr.bf16.vlgmr.msra.gmra.mrb[16].mxu0 %v2894_v20 }
 0x76d   :  { %v3634_v45 = vpop.f32.mrb[24].mxu1 }
 0x76e   :  { %v3656_v46 = vpop.f32.mrb[16].mxu0  ;;  %v3635_v50 = vpop.f32.mrb[25].mxu1 }
 0x76f   :  { %v3636_v51 = vadd.f32 %v3635_v50, %v3634_v45  ;;  %v3657_v52 = vpop.f32.mrb[17].mxu0  ;;  %v3637_v53 = vpop.f32.mrb[26].mxu1 }
 0x770   :  { %v3658_v54 = vadd.f32 %v3657_v52, %v3656_v46  ;;  %v3659_v15 = vpop.f32.mrb[18].mxu0  ;;  %v3638_v55 = vpop.f32.mrb[27].mxu1 }
 0x771   :  { %v3194_v56 = vadd.f32 %v3636_v51, %v3542_v48  ;;  %v3660_v30 = vpop.f32.mrb[19].mxu0 }
 0x773   :  { %v3234_v57 = vadd.f32 %v3658_v54, %v3194_v56 }
 0x775   :  { %3239 = vst [vmem:[#allocation14] sm:$0xff] %v3234_v57 }
 0x776   :  { %4102 = shalt.err (!%p4099_p4)
}
 0x777   :  { %s4103_s19 = scalar_lea.hbm %s4555_s14, 128 }
 0x778   :  { %p4104_p5 = scmp.ne.s32.totalorder %s4555_s14, %s4103_s19  ;;  %p4107_p6 = scmp.lt.u32.totalorder %s4103_s19, %s4555_s14 }
 0x77a   :  { %p4109_p7 = pnand %p4107_p6, %p4104_p5 }
 0x77c   :  { %4112 = shalt.err (!%p4109_p7)
}
 0x77d   :  { %3249 = dma.vmem_to_hbm [thread:$0]  %s3247_s6, 128, %s4555_s14, [#allocation4]  }
 0x77e   :  { %4121 = dma.done.wait [#allocation4], 128  }
 0x77f   :  { %4122 = vsyncadd [#allocation4], 4294967168 }
 0x780   :  { %3253 = vsyncpa [#allocation3], 1 }
 0x781   :  { %3254 = vsyncpa [#allocation6], 1 }
 0x782   :  { %3255 = vsyncpa [#allocation9], 1 }
 0x783   :  { %3256 = vsyncpa [#allocation12], 1 }
 0x784   :  { %3257 = vsyncpa [#allocation4], 1 }

</bundles_post_ra>
